<compile_context>
chip_gen: v5e
topology: v5e:2x2
jax: 0.10.0
libtpu: 0.0.40
codegen_flags: <defaults>
</compile_context>

<pallas_src>
import functools

import jax
import jax.numpy as jnp
from jax import lax
from jax.experimental import pallas as pl
from jax.experimental.pallas import tpu as pltpu


# --------------------------------------------------------------------------- #
# Fused forward kernel: conv1(GEMM) -> conv2 -> conv3 -> fc1 -> fc2, all in VMEM
# --------------------------------------------------------------------------- #
def _fused_forward_kernel(p1_ref, c1w_ref, c1b_ref, c2w_ref, c2b_ref,
                          c3w_ref, c3b_ref, f1w_ref, f1b_ref, f2w_ref, f2b_ref,
                          o_ref, *, tb, h1, wd1, c1, k2, s2, h2, wd2, c2,
                          k3, s3, h3, wd3, c3):
    f32 = jnp.float32
    bf16 = jnp.bfloat16

    # ---- conv1: GEMM over pre-built patches (rows ordered (b, oh, ow)) -------
    a1 = jnp.dot(p1_ref[...], c1w_ref[...], preferred_element_type=f32)
    a1 = jnp.maximum(a1 + c1b_ref[...], 0.0)            # [tb*h1*wd1, c1]  f32
    a1 = a1.reshape(tb, h1, wd1, c1)                     # NHWC view (row regroup only)

    # ---- conv2: in-VMEM im2col, one patch row per output position ------------
    patches2 = []
    for oh in range(h2):
        for ow in range(wd2):
            pieces = [a1[:, s2 * oh + i, s2 * ow + j, :]           # [tb, c1]
                      for i in range(k2) for j in range(k2)]
            patches2.append(jnp.concatenate(pieces, axis=-1))      # [tb, k2*k2*c1]
    p2 = jnp.concatenate(patches2, axis=0)               # [h2*wd2*tb, K2], rows (pos, b)
    a2 = jnp.dot(p2.astype(bf16), c2w_ref[...], preferred_element_type=f32)
    a2 = jnp.maximum(a2 + c2b_ref[...], 0.0)             # [h2*wd2*tb, c2]  f32

    # lane-flatten conv2 output per batch row; lane ordering is (h2, w2, c)
    a2_flat = jnp.concatenate(
        [a2[p * tb:(p + 1) * tb, :] for p in range(h2 * wd2)], axis=-1)

    # ---- conv3 ----------------------------------------------------------------
    if h3 == 1 and wd3 == 1 and k3 == h2 and k3 == wd2:
        # single output position: its patch is the whole conv2 feature map
        a3 = jnp.dot(a2_flat.astype(bf16), c3w_ref[...], preferred_element_type=f32)
        feat = jnp.maximum(a3 + c3b_ref[...], 0.0)       # [tb, c3]
    else:
        patches3 = []
        for oh in range(h3):
            for ow in range(wd3):
                pieces = []
                for i in range(k3):
                    for j in range(k3):
                        st = ((s3 * oh + i) * wd2 + (s3 * ow + j)) * c2
                        pieces.append(a2_flat[:, st:st + c2])
                patches3.append(jnp.concatenate(pieces, axis=-1))
        p3 = jnp.concatenate(patches3, axis=0)           # [h3*wd3*tb, K3]
        a3 = jnp.dot(p3.astype(bf16), c3w_ref[...], preferred_element_type=f32)
        a3 = jnp.maximum(a3 + c3b_ref[...], 0.0)
        # flatten to (h3, w3, c) per batch row (fc1 weights use this K ordering)
        feat = jnp.concatenate(
            [a3[p * tb:(p + 1) * tb, :] for p in range(h3 * wd3)], axis=-1)

    # ---- fc1 + ReLU ------------------------------------------------------------
    h = jnp.dot(feat.astype(bf16), f1w_ref[...], preferred_element_type=f32)
    h = jnp.maximum(h + f1b_ref[...], 0.0)               # [tb, 256]

    # ---- fc2 (output lane-padded to a multiple of 128) -------------------------
    y = jnp.dot(h.astype(bf16), f2w_ref[...], preferred_element_type=f32)
    o_ref[...] = (y + f2b_ref[...]).astype(o_ref.dtype)


# --------------------------------------------------------------------------- #
# XLA-side glue: conv1 im2col of the raw input (single preprocessing fusion)
# --------------------------------------------------------------------------- #
def _conv_out(s, k, st):
    return (s - k) // st + 1


def _conv1_patches(x, kh, kw, s):
    """NCHW x -> conv1 im2col patches [B*Ho*Wo, kh*kw*C] with K ordered (i, j, c)."""
    B, C, H, W = x.shape
    Ho = _conv_out(H, kh, s)
    Wo = _conv_out(W, kw, s)
    xh = jnp.transpose(x, (0, 2, 3, 1))                  # NHWC (one-time, raw input only)
    cols = []
    for i in range(kh):
        for j in range(kw):
            cols.append(xh[:, i:i + s * (Ho - 1) + 1:s, j:j + s * (Wo - 1) + 1:s, :])
    p = jnp.stack(cols, axis=3)                          # [B, Ho, Wo, kh*kw, C]
    return p.reshape(B * Ho * Wo, kh * kw * C).astype(jnp.bfloat16)


# --------------------------------------------------------------------------- #
# Parameters: generated once in kernel-ready layout (bf16 [K, N] weights, f32 bias)
# --------------------------------------------------------------------------- #
def init_params(key, input_size, output_size):
    cin, H, W = input_size
    h1, w1 = _conv_out(H, 8, 4), _conv_out(W, 8, 4)
    h2, w2 = _conv_out(h1, 4, 2), _conv_out(w1, 4, 2)
    h3, w3 = _conv_out(h2, 3, 1), _conv_out(w2, 3, 1)
    flat = h3 * w3 * 64
    npad = max(128, ((output_size + 127) // 128) * 128)

    def uinit(k, shape, fan_in):
        bound = 1.0 / jnp.sqrt(float(fan_in))
        return jax.random.uniform(k, shape, jnp.float32, -bound, bound)

    def conv_w(k, cout, cin_, ksz):
        # PyTorch layout [Cout, Cin, kh, kw] -> kernel-ready [kh*kw*Cin, Cout], bf16.
        w = uinit(k, (cout, cin_, ksz, ksz), cin_ * ksz * ksz)
        return (jnp.transpose(w, (2, 3, 1, 0))
                .reshape(ksz * ksz * cin_, cout).astype(jnp.bfloat16))

    ks = jax.random.split(key, 10)
    params = {
        "c1_w": conv_w(ks[0], 32, cin, 8),
        "c1_b": uinit(ks[1], (1, 32), cin * 8 * 8),
        "c2_w": conv_w(ks[2], 64, 32, 4),
        "c2_b": uinit(ks[3], (1, 64), 32 * 4 * 4),
        "c3_w": conv_w(ks[4], 64, 64, 3),
        "c3_b": uinit(ks[5], (1, 64), 64 * 3 * 3),
        # fc1 K ordering is (h3, w3, c); with this conv stack h3 = w3 = 1 so it matches
        # PyTorch's (c, h3, w3) .view flatten.  (A PyTorch-imported fc1 weight with
        # h3*w3 > 1 would be permuted into this ordering once, here at init.)
        "fc1_w": uinit(ks[6], (flat, 256), flat).astype(jnp.bfloat16),
        "fc1_b": uinit(ks[7], (1, 256), flat),
        # fc2 zero-padded on the output (lane) dim to a multiple of 128 so the kernel's
        # final store is lane-dense; the wrapper slices back to output_size.
        "fc2_w": jnp.pad(uinit(ks[8], (256, output_size), 256),
                         ((0, 0), (0, npad - output_size))).astype(jnp.bfloat16),
        "fc2_b": jnp.pad(uinit(ks[9], (1, output_size), 256),
                         ((0, 0), (0, npad - output_size))),
    }
    return params


# --------------------------------------------------------------------------- #
# Forward pass (mirrors ConvolutionNN.forward) — one fused pallas_call
# --------------------------------------------------------------------------- #
@functools.partial(jax.jit, static_argnames=("out_dim",))
def convolution_nn_forward(params, x, *, out_dim):
    B, C, H, W = x.shape
    k1, s1 = 8, 4
    k2, s2 = 4, 2
    k3, s3 = 3, 1
    h1, w1 = _conv_out(H, k1, s1), _conv_out(W, k1, s1)
    h2, w2 = _conv_out(h1, k2, s2), _conv_out(w1, k2, s2)
    h3, w3 = _conv_out(h2, k3, s3), _conv_out(w2, k3, s3)

    p1 = _conv1_patches(x, k1, k1, s1)                   # [B*h1*w1, k1*k1*C] bf16

    # Batch tiling: one grid step per `tb` batches ("parallel" -> megacore split).
    if B <= 8 or B % 8 != 0:
        tb = B
    else:
        tb = 8
        while tb * 2 <= 32 and B % (tb * 2) == 0:
            tb *= 2
    grid = (B // tb,)
    m1 = tb * h1 * w1
    npad = params["fc2_w"].shape[1]

    kernel = functools.partial(
        _fused_forward_kernel,
        tb=tb, h1=h1, wd1=w1, c1=32, k2=k2, s2=s2, h2=h2, wd2=w2, c2=64,
        k3=k3, s3=s3, h3=h3, wd3=w3, c3=64)

    const2 = lambda i: (0, 0)
    y = pl.pallas_call(
        kernel,
        out_shape=jax.ShapeDtypeStruct((B, npad), jnp.float32),
        grid=grid,
        in_specs=[
            pl.BlockSpec((m1, p1.shape[1]), lambda i: (i, 0)),
            pl.BlockSpec(params["c1_w"].shape, const2),
            pl.BlockSpec(params["c1_b"].shape, const2),
            pl.BlockSpec(params["c2_w"].shape, const2),
            pl.BlockSpec(params["c2_b"].shape, const2),
            pl.BlockSpec(params["c3_w"].shape, const2),
            pl.BlockSpec(params["c3_b"].shape, const2),
            pl.BlockSpec(params["fc1_w"].shape, const2),
            pl.BlockSpec(params["fc1_b"].shape, const2),
            pl.BlockSpec(params["fc2_w"].shape, const2),
            pl.BlockSpec(params["fc2_b"].shape, const2),
        ],
        out_specs=pl.BlockSpec((tb, npad), lambda i: (i, 0)),
        compiler_params=pltpu.CompilerParams(
            dimension_semantics=("parallel",)),
    )(p1, params["c1_w"], params["c1_b"], params["c2_w"], params["c2_b"],
      params["c3_w"], params["c3_b"], params["fc1_w"], params["fc1_b"],
      params["fc2_w"], params["fc2_b"])
    return y[:, :out_dim]


# --------------------------------------------------------------------------- #
# Pure-JAX f32 reference (same stored weights) for a numerical sanity check
# --------------------------------------------------------------------------- #
def _reference_forward(params, x, out_dim):
    f32 = jnp.float32

    def conv(xn, w_kn, b, cout, ksz, stride):
        cin = xn.shape[1]
        w = w_kn.astype(f32).reshape(ksz, ksz, cin, cout)        # [i, j, ci, co]
        w = jnp.transpose(w, (3, 2, 0, 1))                       # OIHW
        y = lax.conv_general_dilated(xn, w, (stride, stride), "VALID",
                                     dimension_numbers=("NCHW", "OIHW", "NCHW"))
        return jnp.maximum(y + b.astype(f32).reshape(1, cout, 1, 1), 0.0)

    y = conv(x, params["c1_w"], params["c1_b"], 32, 8, 4)
    y = conv(y, params["c2_w"], params["c2_b"], 64, 4, 2)
    y = conv(y, params["c3_w"], params["c3_b"], 64, 3, 1)
    y = y.reshape(y.shape[0], -1)                                # h3 = w3 = 1 here
    y = jnp.maximum(y @ params["fc1_w"].astype(f32) + params["fc1_b"], 0.0)
    y = y @ params["fc2_w"].astype(f32) + params["fc2_b"]
    return y[:, :out_dim]


if __name__ == "__main__":
    # Smallest spatial size that is valid through the 8/4 -> 4/2 -> 3/1 conv stack:
    # 36 -> 8 -> 3 -> 1 spatially.
    input_size = (4, 36, 36)      # (C, H, W)
    output_size = 6
    batch = 2

    key = jax.random.PRNGKey(0)
    k_params, k_x = jax.random.split(key)
    params = init_params(k_params, input_size, output_size)
    x = jax.random.normal(k_x, (batch,) + input_size, dtype=jnp.float32)

    out = convolution_nn_forward(params, x, out_dim=output_size)
    jax.block_until_ready(out)
    assert out.shape == (batch, output_size), out.shape

    ref = _reference_forward(params, x, output_size)
    max_err = float(jnp.max(jnp.abs(out - ref)))
    assert max_err < 5e-2, f"numerical mismatch vs reference: max|diff|={max_err}"

    print("KERNEL_OK")
</pallas_src>

<mosaic_0001>
module attributes {stable_mosaic.version = 11 : i64} {
  func.func @_fused_forward_kernel(%arg0: i32, %arg1: memref<128x256xbf16, #tpu.memory_space<vmem>>, %arg2: memref<256x32xbf16, #tpu.memory_space<vmem>>, %arg3: memref<1x32xf32, #tpu.memory_space<vmem>>, %arg4: memref<512x64xbf16, #tpu.memory_space<vmem>>, %arg5: memref<1x64xf32, #tpu.memory_space<vmem>>, %arg6: memref<576x64xbf16, #tpu.memory_space<vmem>>, %arg7: memref<1x64xf32, #tpu.memory_space<vmem>>, %arg8: memref<64x256xbf16, #tpu.memory_space<vmem>>, %arg9: memref<1x256xf32, #tpu.memory_space<vmem>>, %arg10: memref<256x128xbf16, #tpu.memory_space<vmem>>, %arg11: memref<1x128xf32, #tpu.memory_space<vmem>>, %arg12: memref<2x128xf32, #tpu.memory_space<vmem>>) attributes {dimension_semantics = [#tpu.dimension_semantics<parallel>], iteration_bounds = array<i64: 1>, scalar_prefetch = 0 : i64, scratch_operands = 0 : i64, tpu.core_type = #tpu.core_type<tc>, window_params = [{transform_indices = @transform_0, window_bounds = array<i64: 128, 256>}, {pipeline_mode = #tpu.pipeline_mode<synchronous>, transform_indices = @transform_1, window_bounds = array<i64: 256, 32>}, {pipeline_mode = #tpu.pipeline_mode<synchronous>, transform_indices = @transform_2, window_bounds = array<i64: 1, 32>}, {pipeline_mode = #tpu.pipeline_mode<synchronous>, transform_indices = @transform_3, window_bounds = array<i64: 512, 64>}, {pipeline_mode = #tpu.pipeline_mode<synchronous>, transform_indices = @transform_4, window_bounds = array<i64: 1, 64>}, {pipeline_mode = #tpu.pipeline_mode<synchronous>, transform_indices = @transform_5, window_bounds = array<i64: 576, 64>}, {pipeline_mode = #tpu.pipeline_mode<synchronous>, transform_indices = @transform_6, window_bounds = array<i64: 1, 64>}, {pipeline_mode = #tpu.pipeline_mode<synchronous>, transform_indices = @transform_7, window_bounds = array<i64: 64, 256>}, {pipeline_mode = #tpu.pipeline_mode<synchronous>, transform_indices = @transform_8, window_bounds = array<i64: 1, 256>}, {pipeline_mode = #tpu.pipeline_mode<synchronous>, transform_indices = @transform_9, window_bounds = array<i64: 256, 128>}, {pipeline_mode = #tpu.pipeline_mode<synchronous>, transform_indices = @transform_10, window_bounds = array<i64: 1, 128>}, {transform_indices = @transform_11, window_bounds = array<i64: 2, 128>}]} {
    %c0 = arith.constant 0 : index
    %c0_0 = arith.constant 0 : index
    %0 = vector.load %arg1[%c0, %c0_0] : memref<128x256xbf16, #tpu.memory_space<vmem>>, vector<128x256xbf16>
    %c0_1 = arith.constant 0 : index
    %c0_2 = arith.constant 0 : index
    %1 = vector.load %arg2[%c0_1, %c0_2] : memref<256x32xbf16, #tpu.memory_space<vmem>>, vector<256x32xbf16>
    %cst = arith.constant dense<0.000000e+00> : vector<128x32xf32>
    %2 = tpu.matmul %0, %1, %cst {dimension_numbers = #tpu.dot_dimension_numbers<[1], [0], [0], [1], [0, 0, 1, 1], [], []>} : vector<128x256xbf16>, vector<256x32xbf16>, vector<128x32xf32> -> vector<128x32xf32>
    %c0_3 = arith.constant 0 : index
    %c0_4 = arith.constant 0 : index
    %3 = vector.load %arg3[%c0_3, %c0_4] : memref<1x32xf32, #tpu.memory_space<vmem>>, vector<1x32xf32>
    %4 = vector.broadcast %3 : vector<1x32xf32> to vector<128x32xf32>
    %5 = arith.addf %2, %4 : vector<128x32xf32>
    %cst_5 = arith.constant 0.000000e+00 : f32
    %6 = vector.broadcast %cst_5 : f32 to vector<128x32xf32>
    %7 = arith.maximumf %5, %6 : vector<128x32xf32>
    %8 = vector.shape_cast %7 : vector<128x32xf32> to vector<2x8x8x32xf32>
    %9 = vector.extract_strided_slice %8 {offsets = [0, 0, 0, 0], sizes = [2, 1, 1, 32], strides = [1, 1, 1, 1]} : vector<2x8x8x32xf32> to vector<2x1x1x32xf32>
    %10 = vector.shape_cast %9 : vector<2x1x1x32xf32> to vector<2x32xf32>
    %11 = vector.extract_strided_slice %8 {offsets = [0, 0, 1, 0], sizes = [2, 1, 1, 32], strides = [1, 1, 1, 1]} : vector<2x8x8x32xf32> to vector<2x1x1x32xf32>
    %12 = vector.shape_cast %11 : vector<2x1x1x32xf32> to vector<2x32xf32>
    %13 = vector.extract_strided_slice %8 {offsets = [0, 0, 2, 0], sizes = [2, 1, 1, 32], strides = [1, 1, 1, 1]} : vector<2x8x8x32xf32> to vector<2x1x1x32xf32>
    %14 = vector.shape_cast %13 : vector<2x1x1x32xf32> to vector<2x32xf32>
    %15 = vector.extract_strided_slice %8 {offsets = [0, 0, 3, 0], sizes = [2, 1, 1, 32], strides = [1, 1, 1, 1]} : vector<2x8x8x32xf32> to vector<2x1x1x32xf32>
    %16 = vector.shape_cast %15 : vector<2x1x1x32xf32> to vector<2x32xf32>
    %17 = vector.extract_strided_slice %8 {offsets = [0, 1, 0, 0], sizes = [2, 1, 1, 32], strides = [1, 1, 1, 1]} : vector<2x8x8x32xf32> to vector<2x1x1x32xf32>
    %18 = vector.shape_cast %17 : vector<2x1x1x32xf32> to vector<2x32xf32>
    %19 = vector.extract_strided_slice %8 {offsets = [0, 1, 1, 0], sizes = [2, 1, 1, 32], strides = [1, 1, 1, 1]} : vector<2x8x8x32xf32> to vector<2x1x1x32xf32>
    %20 = vector.shape_cast %19 : vector<2x1x1x32xf32> to vector<2x32xf32>
    %21 = vector.extract_strided_slice %8 {offsets = [0, 1, 2, 0], sizes = [2, 1, 1, 32], strides = [1, 1, 1, 1]} : vector<2x8x8x32xf32> to vector<2x1x1x32xf32>
    %22 = vector.shape_cast %21 : vector<2x1x1x32xf32> to vector<2x32xf32>
    %23 = vector.extract_strided_slice %8 {offsets = [0, 1, 3, 0], sizes = [2, 1, 1, 32], strides = [1, 1, 1, 1]} : vector<2x8x8x32xf32> to vector<2x1x1x32xf32>
    %24 = vector.shape_cast %23 : vector<2x1x1x32xf32> to vector<2x32xf32>
    %25 = vector.extract_strided_slice %8 {offsets = [0, 2, 0, 0], sizes = [2, 1, 1, 32], strides = [1, 1, 1, 1]} : vector<2x8x8x32xf32> to vector<2x1x1x32xf32>
    %26 = vector.shape_cast %25 : vector<2x1x1x32xf32> to vector<2x32xf32>
    %27 = vector.extract_strided_slice %8 {offsets = [0, 2, 1, 0], sizes = [2, 1, 1, 32], strides = [1, 1, 1, 1]} : vector<2x8x8x32xf32> to vector<2x1x1x32xf32>
    %28 = vector.shape_cast %27 : vector<2x1x1x32xf32> to vector<2x32xf32>
    %29 = vector.extract_strided_slice %8 {offsets = [0, 2, 2, 0], sizes = [2, 1, 1, 32], strides = [1, 1, 1, 1]} : vector<2x8x8x32xf32> to vector<2x1x1x32xf32>
    %30 = vector.shape_cast %29 : vector<2x1x1x32xf32> to vector<2x32xf32>
    %31 = vector.extract_strided_slice %8 {offsets = [0, 2, 3, 0], sizes = [2, 1, 1, 32], strides = [1, 1, 1, 1]} : vector<2x8x8x32xf32> to vector<2x1x1x32xf32>
    %32 = vector.shape_cast %31 : vector<2x1x1x32xf32> to vector<2x32xf32>
    %33 = vector.extract_strided_slice %8 {offsets = [0, 3, 0, 0], sizes = [2, 1, 1, 32], strides = [1, 1, 1, 1]} : vector<2x8x8x32xf32> to vector<2x1x1x32xf32>
    %34 = vector.shape_cast %33 : vector<2x1x1x32xf32> to vector<2x32xf32>
    %35 = vector.extract_strided_slice %8 {offsets = [0, 3, 1, 0], sizes = [2, 1, 1, 32], strides = [1, 1, 1, 1]} : vector<2x8x8x32xf32> to vector<2x1x1x32xf32>
    %36 = vector.shape_cast %35 : vector<2x1x1x32xf32> to vector<2x32xf32>
    %37 = vector.extract_strided_slice %8 {offsets = [0, 3, 2, 0], sizes = [2, 1, 1, 32], strides = [1, 1, 1, 1]} : vector<2x8x8x32xf32> to vector<2x1x1x32xf32>
    %38 = vector.shape_cast %37 : vector<2x1x1x32xf32> to vector<2x32xf32>
    %39 = vector.extract_strided_slice %8 {offsets = [0, 3, 3, 0], sizes = [2, 1, 1, 32], strides = [1, 1, 1, 1]} : vector<2x8x8x32xf32> to vector<2x1x1x32xf32>
    %40 = vector.shape_cast %39 : vector<2x1x1x32xf32> to vector<2x32xf32>
    %41 = tpu.concatenate %10, %12, %14, %16, %18, %20, %22, %24, %26, %28, %30, %32, %34, %36, %38, %40 in 1 : vector<2x32xf32>, vector<2x32xf32>, vector<2x32xf32>, vector<2x32xf32>, vector<2x32xf32>, vector<2x32xf32>, vector<2x32xf32>, vector<2x32xf32>, vector<2x32xf32>, vector<2x32xf32>, vector<2x32xf32>, vector<2x32xf32>, vector<2x32xf32>, vector<2x32xf32>, vector<2x32xf32>, vector<2x32xf32> -> vector<2x512xf32>
    %42 = vector.extract_strided_slice %8 {offsets = [0, 0, 2, 0], sizes = [2, 1, 1, 32], strides = [1, 1, 1, 1]} : vector<2x8x8x32xf32> to vector<2x1x1x32xf32>
    %43 = vector.shape_cast %42 : vector<2x1x1x32xf32> to vector<2x32xf32>
    %44 = vector.extract_strided_slice %8 {offsets = [0, 0, 3, 0], sizes = [2, 1, 1, 32], strides = [1, 1, 1, 1]} : vector<2x8x8x32xf32> to vector<2x1x1x32xf32>
    %45 = vector.shape_cast %44 : vector<2x1x1x32xf32> to vector<2x32xf32>
    %46 = vector.extract_strided_slice %8 {offsets = [0, 0, 4, 0], sizes = [2, 1, 1, 32], strides = [1, 1, 1, 1]} : vector<2x8x8x32xf32> to vector<2x1x1x32xf32>
    %47 = vector.shape_cast %46 : vector<2x1x1x32xf32> to vector<2x32xf32>
    %48 = vector.extract_strided_slice %8 {offsets = [0, 0, 5, 0], sizes = [2, 1, 1, 32], strides = [1, 1, 1, 1]} : vector<2x8x8x32xf32> to vector<2x1x1x32xf32>
    %49 = vector.shape_cast %48 : vector<2x1x1x32xf32> to vector<2x32xf32>
    %50 = vector.extract_strided_slice %8 {offsets = [0, 1, 2, 0], sizes = [2, 1, 1, 32], strides = [1, 1, 1, 1]} : vector<2x8x8x32xf32> to vector<2x1x1x32xf32>
    %51 = vector.shape_cast %50 : vector<2x1x1x32xf32> to vector<2x32xf32>
    %52 = vector.extract_strided_slice %8 {offsets = [0, 1, 3, 0], sizes = [2, 1, 1, 32], strides = [1, 1, 1, 1]} : vector<2x8x8x32xf32> to vector<2x1x1x32xf32>
    %53 = vector.shape_cast %52 : vector<2x1x1x32xf32> to vector<2x32xf32>
    %54 = vector.extract_strided_slice %8 {offsets = [0, 1, 4, 0], sizes = [2, 1, 1, 32], strides = [1, 1, 1, 1]} : vector<2x8x8x32xf32> to vector<2x1x1x32xf32>
    %55 = vector.shape_cast %54 : vector<2x1x1x32xf32> to vector<2x32xf32>
    %56 = vector.extract_strided_slice %8 {offsets = [0, 1, 5, 0], sizes = [2, 1, 1, 32], strides = [1, 1, 1, 1]} : vector<2x8x8x32xf32> to vector<2x1x1x32xf32>
    %57 = vector.shape_cast %56 : vector<2x1x1x32xf32> to vector<2x32xf32>
    %58 = vector.extract_strided_slice %8 {offsets = [0, 2, 2, 0], sizes = [2, 1, 1, 32], strides = [1, 1, 1, 1]} : vector<2x8x8x32xf32> to vector<2x1x1x32xf32>
    %59 = vector.shape_cast %58 : vector<2x1x1x32xf32> to vector<2x32xf32>
    %60 = vector.extract_strided_slice %8 {offsets = [0, 2, 3, 0], sizes = [2, 1, 1, 32], strides = [1, 1, 1, 1]} : vector<2x8x8x32xf32> to vector<2x1x1x32xf32>
    %61 = vector.shape_cast %60 : vector<2x1x1x32xf32> to vector<2x32xf32>
    %62 = vector.extract_strided_slice %8 {offsets = [0, 2, 4, 0], sizes = [2, 1, 1, 32], strides = [1, 1, 1, 1]} : vector<2x8x8x32xf32> to vector<2x1x1x32xf32>
    %63 = vector.shape_cast %62 : vector<2x1x1x32xf32> to vector<2x32xf32>
    %64 = vector.extract_strided_slice %8 {offsets = [0, 2, 5, 0], sizes = [2, 1, 1, 32], strides = [1, 1, 1, 1]} : vector<2x8x8x32xf32> to vector<2x1x1x32xf32>
    %65 = vector.shape_cast %64 : vector<2x1x1x32xf32> to vector<2x32xf32>
    %66 = vector.extract_strided_slice %8 {offsets = [0, 3, 2, 0], sizes = [2, 1, 1, 32], strides = [1, 1, 1, 1]} : vector<2x8x8x32xf32> to vector<2x1x1x32xf32>
    %67 = vector.shape_cast %66 : vector<2x1x1x32xf32> to vector<2x32xf32>
    %68 = vector.extract_strided_slice %8 {offsets = [0, 3, 3, 0], sizes = [2, 1, 1, 32], strides = [1, 1, 1, 1]} : vector<2x8x8x32xf32> to vector<2x1x1x32xf32>
    %69 = vector.shape_cast %68 : vector<2x1x1x32xf32> to vector<2x32xf32>
    %70 = vector.extract_strided_slice %8 {offsets = [0, 3, 4, 0], sizes = [2, 1, 1, 32], strides = [1, 1, 1, 1]} : vector<2x8x8x32xf32> to vector<2x1x1x32xf32>
    %71 = vector.shape_cast %70 : vector<2x1x1x32xf32> to vector<2x32xf32>
    %72 = vector.extract_strided_slice %8 {offsets = [0, 3, 5, 0], sizes = [2, 1, 1, 32], strides = [1, 1, 1, 1]} : vector<2x8x8x32xf32> to vector<2x1x1x32xf32>
    %73 = vector.shape_cast %72 : vector<2x1x1x32xf32> to vector<2x32xf32>
    %74 = tpu.concatenate %43, %45, %47, %49, %51, %53, %55, %57, %59, %61, %63, %65, %67, %69, %71, %73 in 1 : vector<2x32xf32>, vector<2x32xf32>, vector<2x32xf32>, vector<2x32xf32>, vector<2x32xf32>, vector<2x32xf32>, vector<2x32xf32>, vector<2x32xf32>, vector<2x32xf32>, vector<2x32xf32>, vector<2x32xf32>, vector<2x32xf32>, vector<2x32xf32>, vector<2x32xf32>, vector<2x32xf32>, vector<2x32xf32> -> vector<2x512xf32>
    %75 = vector.extract_strided_slice %8 {offsets = [0, 0, 4, 0], sizes = [2, 1, 1, 32], strides = [1, 1, 1, 1]} : vector<2x8x8x32xf32> to vector<2x1x1x32xf32>
    %76 = vector.shape_cast %75 : vector<2x1x1x32xf32> to vector<2x32xf32>
    %77 = vector.extract_strided_slice %8 {offsets = [0, 0, 5, 0], sizes = [2, 1, 1, 32], strides = [1, 1, 1, 1]} : vector<2x8x8x32xf32> to vector<2x1x1x32xf32>
    %78 = vector.shape_cast %77 : vector<2x1x1x32xf32> to vector<2x32xf32>
    %79 = vector.extract_strided_slice %8 {offsets = [0, 0, 6, 0], sizes = [2, 1, 1, 32], strides = [1, 1, 1, 1]} : vector<2x8x8x32xf32> to vector<2x1x1x32xf32>
    %80 = vector.shape_cast %79 : vector<2x1x1x32xf32> to vector<2x32xf32>
    %81 = vector.extract_strided_slice %8 {offsets = [0, 0, 7, 0], sizes = [2, 1, 1, 32], strides = [1, 1, 1, 1]} : vector<2x8x8x32xf32> to vector<2x1x1x32xf32>
    %82 = vector.shape_cast %81 : vector<2x1x1x32xf32> to vector<2x32xf32>
    %83 = vector.extract_strided_slice %8 {offsets = [0, 1, 4, 0], sizes = [2, 1, 1, 32], strides = [1, 1, 1, 1]} : vector<2x8x8x32xf32> to vector<2x1x1x32xf32>
    %84 = vector.shape_cast %83 : vector<2x1x1x32xf32> to vector<2x32xf32>
    %85 = vector.extract_strided_slice %8 {offsets = [0, 1, 5, 0], sizes = [2, 1, 1, 32], strides = [1, 1, 1, 1]} : vector<2x8x8x32xf32> to vector<2x1x1x32xf32>
    %86 = vector.shape_cast %85 : vector<2x1x1x32xf32> to vector<2x32xf32>
    %87 = vector.extract_strided_slice %8 {offsets = [0, 1, 6, 0], sizes = [2, 1, 1, 32], strides = [1, 1, 1, 1]} : vector<2x8x8x32xf32> to vector<2x1x1x32xf32>
    %88 = vector.shape_cast %87 : vector<2x1x1x32xf32> to vector<2x32xf32>
    %89 = vector.extract_strided_slice %8 {offsets = [0, 1, 7, 0], sizes = [2, 1, 1, 32], strides = [1, 1, 1, 1]} : vector<2x8x8x32xf32> to vector<2x1x1x32xf32>
    %90 = vector.shape_cast %89 : vector<2x1x1x32xf32> to vector<2x32xf32>
    %91 = vector.extract_strided_slice %8 {offsets = [0, 2, 4, 0], sizes = [2, 1, 1, 32], strides = [1, 1, 1, 1]} : vector<2x8x8x32xf32> to vector<2x1x1x32xf32>
    %92 = vector.shape_cast %91 : vector<2x1x1x32xf32> to vector<2x32xf32>
    %93 = vector.extract_strided_slice %8 {offsets = [0, 2, 5, 0], sizes = [2, 1, 1, 32], strides = [1, 1, 1, 1]} : vector<2x8x8x32xf32> to vector<2x1x1x32xf32>
    %94 = vector.shape_cast %93 : vector<2x1x1x32xf32> to vector<2x32xf32>
    %95 = vector.extract_strided_slice %8 {offsets = [0, 2, 6, 0], sizes = [2, 1, 1, 32], strides = [1, 1, 1, 1]} : vector<2x8x8x32xf32> to vector<2x1x1x32xf32>
    %96 = vector.shape_cast %95 : vector<2x1x1x32xf32> to vector<2x32xf32>
    %97 = vector.extract_strided_slice %8 {offsets = [0, 2, 7, 0], sizes = [2, 1, 1, 32], strides = [1, 1, 1, 1]} : vector<2x8x8x32xf32> to vector<2x1x1x32xf32>
    %98 = vector.shape_cast %97 : vector<2x1x1x32xf32> to vector<2x32xf32>
    %99 = vector.extract_strided_slice %8 {offsets = [0, 3, 4, 0], sizes = [2, 1, 1, 32], strides = [1, 1, 1, 1]} : vector<2x8x8x32xf32> to vector<2x1x1x32xf32>
    %100 = vector.shape_cast %99 : vector<2x1x1x32xf32> to vector<2x32xf32>
    %101 = vector.extract_strided_slice %8 {offsets = [0, 3, 5, 0], sizes = [2, 1, 1, 32], strides = [1, 1, 1, 1]} : vector<2x8x8x32xf32> to vector<2x1x1x32xf32>
    %102 = vector.shape_cast %101 : vector<2x1x1x32xf32> to vector<2x32xf32>
    %103 = vector.extract_strided_slice %8 {offsets = [0, 3, 6, 0], sizes = [2, 1, 1, 32], strides = [1, 1, 1, 1]} : vector<2x8x8x32xf32> to vector<2x1x1x32xf32>
    %104 = vector.shape_cast %103 : vector<2x1x1x32xf32> to vector<2x32xf32>
    %105 = vector.extract_strided_slice %8 {offsets = [0, 3, 7, 0], sizes = [2, 1, 1, 32], strides = [1, 1, 1, 1]} : vector<2x8x8x32xf32> to vector<2x1x1x32xf32>
    %106 = vector.shape_cast %105 : vector<2x1x1x32xf32> to vector<2x32xf32>
    %107 = tpu.concatenate %76, %78, %80, %82, %84, %86, %88, %90, %92, %94, %96, %98, %100, %102, %104, %106 in 1 : vector<2x32xf32>, vector<2x32xf32>, vector<2x32xf32>, vector<2x32xf32>, vector<2x32xf32>, vector<2x32xf32>, vector<2x32xf32>, vector<2x32xf32>, vector<2x32xf32>, vector<2x32xf32>, vector<2x32xf32>, vector<2x32xf32>, vector<2x32xf32>, vector<2x32xf32>, vector<2x32xf32>, vector<2x32xf32> -> vector<2x512xf32>
    %108 = vector.extract_strided_slice %8 {offsets = [0, 2, 0, 0], sizes = [2, 1, 1, 32], strides = [1, 1, 1, 1]} : vector<2x8x8x32xf32> to vector<2x1x1x32xf32>
    %109 = vector.shape_cast %108 : vector<2x1x1x32xf32> to vector<2x32xf32>
    %110 = vector.extract_strided_slice %8 {offsets = [0, 2, 1, 0], sizes = [2, 1, 1, 32], strides = [1, 1, 1, 1]} : vector<2x8x8x32xf32> to vector<2x1x1x32xf32>
    %111 = vector.shape_cast %110 : vector<2x1x1x32xf32> to vector<2x32xf32>
    %112 = vector.extract_strided_slice %8 {offsets = [0, 2, 2, 0], sizes = [2, 1, 1, 32], strides = [1, 1, 1, 1]} : vector<2x8x8x32xf32> to vector<2x1x1x32xf32>
    %113 = vector.shape_cast %112 : vector<2x1x1x32xf32> to vector<2x32xf32>
    %114 = vector.extract_strided_slice %8 {offsets = [0, 2, 3, 0], sizes = [2, 1, 1, 32], strides = [1, 1, 1, 1]} : vector<2x8x8x32xf32> to vector<2x1x1x32xf32>
    %115 = vector.shape_cast %114 : vector<2x1x1x32xf32> to vector<2x32xf32>
    %116 = vector.extract_strided_slice %8 {offsets = [0, 3, 0, 0], sizes = [2, 1, 1, 32], strides = [1, 1, 1, 1]} : vector<2x8x8x32xf32> to vector<2x1x1x32xf32>
    %117 = vector.shape_cast %116 : vector<2x1x1x32xf32> to vector<2x32xf32>
    %118 = vector.extract_strided_slice %8 {offsets = [0, 3, 1, 0], sizes = [2, 1, 1, 32], strides = [1, 1, 1, 1]} : vector<2x8x8x32xf32> to vector<2x1x1x32xf32>
    %119 = vector.shape_cast %118 : vector<2x1x1x32xf32> to vector<2x32xf32>
    %120 = vector.extract_strided_slice %8 {offsets = [0, 3, 2, 0], sizes = [2, 1, 1, 32], strides = [1, 1, 1, 1]} : vector<2x8x8x32xf32> to vector<2x1x1x32xf32>
    %121 = vector.shape_cast %120 : vector<2x1x1x32xf32> to vector<2x32xf32>
    %122 = vector.extract_strided_slice %8 {offsets = [0, 3, 3, 0], sizes = [2, 1, 1, 32], strides = [1, 1, 1, 1]} : vector<2x8x8x32xf32> to vector<2x1x1x32xf32>
    %123 = vector.shape_cast %122 : vector<2x1x1x32xf32> to vector<2x32xf32>
    %124 = vector.extract_strided_slice %8 {offsets = [0, 4, 0, 0], sizes = [2, 1, 1, 32], strides = [1, 1, 1, 1]} : vector<2x8x8x32xf32> to vector<2x1x1x32xf32>
    %125 = vector.shape_cast %124 : vector<2x1x1x32xf32> to vector<2x32xf32>
    %126 = vector.extract_strided_slice %8 {offsets = [0, 4, 1, 0], sizes = [2, 1, 1, 32], strides = [1, 1, 1, 1]} : vector<2x8x8x32xf32> to vector<2x1x1x32xf32>
    %127 = vector.shape_cast %126 : vector<2x1x1x32xf32> to vector<2x32xf32>
    %128 = vector.extract_strided_slice %8 {offsets = [0, 4, 2, 0], sizes = [2, 1, 1, 32], strides = [1, 1, 1, 1]} : vector<2x8x8x32xf32> to vector<2x1x1x32xf32>
    %129 = vector.shape_cast %128 : vector<2x1x1x32xf32> to vector<2x32xf32>
    %130 = vector.extract_strided_slice %8 {offsets = [0, 4, 3, 0], sizes = [2, 1, 1, 32], strides = [1, 1, 1, 1]} : vector<2x8x8x32xf32> to vector<2x1x1x32xf32>
    %131 = vector.shape_cast %130 : vector<2x1x1x32xf32> to vector<2x32xf32>
    %132 = vector.extract_strided_slice %8 {offsets = [0, 5, 0, 0], sizes = [2, 1, 1, 32], strides = [1, 1, 1, 1]} : vector<2x8x8x32xf32> to vector<2x1x1x32xf32>
    %133 = vector.shape_cast %132 : vector<2x1x1x32xf32> to vector<2x32xf32>
    %134 = vector.extract_strided_slice %8 {offsets = [0, 5, 1, 0], sizes = [2, 1, 1, 32], strides = [1, 1, 1, 1]} : vector<2x8x8x32xf32> to vector<2x1x1x32xf32>
    %135 = vector.shape_cast %134 : vector<2x1x1x32xf32> to vector<2x32xf32>
    %136 = vector.extract_strided_slice %8 {offsets = [0, 5, 2, 0], sizes = [2, 1, 1, 32], strides = [1, 1, 1, 1]} : vector<2x8x8x32xf32> to vector<2x1x1x32xf32>
    %137 = vector.shape_cast %136 : vector<2x1x1x32xf32> to vector<2x32xf32>
    %138 = vector.extract_strided_slice %8 {offsets = [0, 5, 3, 0], sizes = [2, 1, 1, 32], strides = [1, 1, 1, 1]} : vector<2x8x8x32xf32> to vector<2x1x1x32xf32>
    %139 = vector.shape_cast %138 : vector<2x1x1x32xf32> to vector<2x32xf32>
    %140 = tpu.concatenate %109, %111, %113, %115, %117, %119, %121, %123, %125, %127, %129, %131, %133, %135, %137, %139 in 1 : vector<2x32xf32>, vector<2x32xf32>, vector<2x32xf32>, vector<2x32xf32>, vector<2x32xf32>, vector<2x32xf32>, vector<2x32xf32>, vector<2x32xf32>, vector<2x32xf32>, vector<2x32xf32>, vector<2x32xf32>, vector<2x32xf32>, vector<2x32xf32>, vector<2x32xf32>, vector<2x32xf32>, vector<2x32xf32> -> vector<2x512xf32>
    %141 = vector.extract_strided_slice %8 {offsets = [0, 2, 2, 0], sizes = [2, 1, 1, 32], strides = [1, 1, 1, 1]} : vector<2x8x8x32xf32> to vector<2x1x1x32xf32>
    %142 = vector.shape_cast %141 : vector<2x1x1x32xf32> to vector<2x32xf32>
    %143 = vector.extract_strided_slice %8 {offsets = [0, 2, 3, 0], sizes = [2, 1, 1, 32], strides = [1, 1, 1, 1]} : vector<2x8x8x32xf32> to vector<2x1x1x32xf32>
    %144 = vector.shape_cast %143 : vector<2x1x1x32xf32> to vector<2x32xf32>
    %145 = vector.extract_strided_slice %8 {offsets = [0, 2, 4, 0], sizes = [2, 1, 1, 32], strides = [1, 1, 1, 1]} : vector<2x8x8x32xf32> to vector<2x1x1x32xf32>
    %146 = vector.shape_cast %145 : vector<2x1x1x32xf32> to vector<2x32xf32>
    %147 = vector.extract_strided_slice %8 {offsets = [0, 2, 5, 0], sizes = [2, 1, 1, 32], strides = [1, 1, 1, 1]} : vector<2x8x8x32xf32> to vector<2x1x1x32xf32>
    %148 = vector.shape_cast %147 : vector<2x1x1x32xf32> to vector<2x32xf32>
    %149 = vector.extract_strided_slice %8 {offsets = [0, 3, 2, 0], sizes = [2, 1, 1, 32], strides = [1, 1, 1, 1]} : vector<2x8x8x32xf32> to vector<2x1x1x32xf32>
    %150 = vector.shape_cast %149 : vector<2x1x1x32xf32> to vector<2x32xf32>
    %151 = vector.extract_strided_slice %8 {offsets = [0, 3, 3, 0], sizes = [2, 1, 1, 32], strides = [1, 1, 1, 1]} : vector<2x8x8x32xf32> to vector<2x1x1x32xf32>
    %152 = vector.shape_cast %151 : vector<2x1x1x32xf32> to vector<2x32xf32>
    %153 = vector.extract_strided_slice %8 {offsets = [0, 3, 4, 0], sizes = [2, 1, 1, 32], strides = [1, 1, 1, 1]} : vector<2x8x8x32xf32> to vector<2x1x1x32xf32>
    %154 = vector.shape_cast %153 : vector<2x1x1x32xf32> to vector<2x32xf32>
    %155 = vector.extract_strided_slice %8 {offsets = [0, 3, 5, 0], sizes = [2, 1, 1, 32], strides = [1, 1, 1, 1]} : vector<2x8x8x32xf32> to vector<2x1x1x32xf32>
    %156 = vector.shape_cast %155 : vector<2x1x1x32xf32> to vector<2x32xf32>
    %157 = vector.extract_strided_slice %8 {offsets = [0, 4, 2, 0], sizes = [2, 1, 1, 32], strides = [1, 1, 1, 1]} : vector<2x8x8x32xf32> to vector<2x1x1x32xf32>
    %158 = vector.shape_cast %157 : vector<2x1x1x32xf32> to vector<2x32xf32>
    %159 = vector.extract_strided_slice %8 {offsets = [0, 4, 3, 0], sizes = [2, 1, 1, 32], strides = [1, 1, 1, 1]} : vector<2x8x8x32xf32> to vector<2x1x1x32xf32>
    %160 = vector.shape_cast %159 : vector<2x1x1x32xf32> to vector<2x32xf32>
    %161 = vector.extract_strided_slice %8 {offsets = [0, 4, 4, 0], sizes = [2, 1, 1, 32], strides = [1, 1, 1, 1]} : vector<2x8x8x32xf32> to vector<2x1x1x32xf32>
    %162 = vector.shape_cast %161 : vector<2x1x1x32xf32> to vector<2x32xf32>
    %163 = vector.extract_strided_slice %8 {offsets = [0, 4, 5, 0], sizes = [2, 1, 1, 32], strides = [1, 1, 1, 1]} : vector<2x8x8x32xf32> to vector<2x1x1x32xf32>
    %164 = vector.shape_cast %163 : vector<2x1x1x32xf32> to vector<2x32xf32>
    %165 = vector.extract_strided_slice %8 {offsets = [0, 5, 2, 0], sizes = [2, 1, 1, 32], strides = [1, 1, 1, 1]} : vector<2x8x8x32xf32> to vector<2x1x1x32xf32>
    %166 = vector.shape_cast %165 : vector<2x1x1x32xf32> to vector<2x32xf32>
    %167 = vector.extract_strided_slice %8 {offsets = [0, 5, 3, 0], sizes = [2, 1, 1, 32], strides = [1, 1, 1, 1]} : vector<2x8x8x32xf32> to vector<2x1x1x32xf32>
    %168 = vector.shape_cast %167 : vector<2x1x1x32xf32> to vector<2x32xf32>
    %169 = vector.extract_strided_slice %8 {offsets = [0, 5, 4, 0], sizes = [2, 1, 1, 32], strides = [1, 1, 1, 1]} : vector<2x8x8x32xf32> to vector<2x1x1x32xf32>
    %170 = vector.shape_cast %169 : vector<2x1x1x32xf32> to vector<2x32xf32>
    %171 = vector.extract_strided_slice %8 {offsets = [0, 5, 5, 0], sizes = [2, 1, 1, 32], strides = [1, 1, 1, 1]} : vector<2x8x8x32xf32> to vector<2x1x1x32xf32>
    %172 = vector.shape_cast %171 : vector<2x1x1x32xf32> to vector<2x32xf32>
    %173 = tpu.concatenate %142, %144, %146, %148, %150, %152, %154, %156, %158, %160, %162, %164, %166, %168, %170, %172 in 1 : vector<2x32xf32>, vector<2x32xf32>, vector<2x32xf32>, vector<2x32xf32>, vector<2x32xf32>, vector<2x32xf32>, vector<2x32xf32>, vector<2x32xf32>, vector<2x32xf32>, vector<2x32xf32>, vector<2x32xf32>, vector<2x32xf32>, vector<2x32xf32>, vector<2x32xf32>, vector<2x32xf32>, vector<2x32xf32> -> vector<2x512xf32>
    %174 = vector.extract_strided_slice %8 {offsets = [0, 2, 4, 0], sizes = [2, 1, 1, 32], strides = [1, 1, 1, 1]} : vector<2x8x8x32xf32> to vector<2x1x1x32xf32>
    %175 = vector.shape_cast %174 : vector<2x1x1x32xf32> to vector<2x32xf32>
    %176 = vector.extract_strided_slice %8 {offsets = [0, 2, 5, 0], sizes = [2, 1, 1, 32], strides = [1, 1, 1, 1]} : vector<2x8x8x32xf32> to vector<2x1x1x32xf32>
    %177 = vector.shape_cast %176 : vector<2x1x1x32xf32> to vector<2x32xf32>
    %178 = vector.extract_strided_slice %8 {offsets = [0, 2, 6, 0], sizes = [2, 1, 1, 32], strides = [1, 1, 1, 1]} : vector<2x8x8x32xf32> to vector<2x1x1x32xf32>
    %179 = vector.shape_cast %178 : vector<2x1x1x32xf32> to vector<2x32xf32>
    %180 = vector.extract_strided_slice %8 {offsets = [0, 2, 7, 0], sizes = [2, 1, 1, 32], strides = [1, 1, 1, 1]} : vector<2x8x8x32xf32> to vector<2x1x1x32xf32>
    %181 = vector.shape_cast %180 : vector<2x1x1x32xf32> to vector<2x32xf32>
    %182 = vector.extract_strided_slice %8 {offsets = [0, 3, 4, 0], sizes = [2, 1, 1, 32], strides = [1, 1, 1, 1]} : vector<2x8x8x32xf32> to vector<2x1x1x32xf32>
    %183 = vector.shape_cast %182 : vector<2x1x1x32xf32> to vector<2x32xf32>
    %184 = vector.extract_strided_slice %8 {offsets = [0, 3, 5, 0], sizes = [2, 1, 1, 32], strides = [1, 1, 1, 1]} : vector<2x8x8x32xf32> to vector<2x1x1x32xf32>
    %185 = vector.shape_cast %184 : vector<2x1x1x32xf32> to vector<2x32xf32>
    %186 = vector.extract_strided_slice %8 {offsets = [0, 3, 6, 0], sizes = [2, 1, 1, 32], strides = [1, 1, 1, 1]} : vector<2x8x8x32xf32> to vector<2x1x1x32xf32>
    %187 = vector.shape_cast %186 : vector<2x1x1x32xf32> to vector<2x32xf32>
    %188 = vector.extract_strided_slice %8 {offsets = [0, 3, 7, 0], sizes = [2, 1, 1, 32], strides = [1, 1, 1, 1]} : vector<2x8x8x32xf32> to vector<2x1x1x32xf32>
    %189 = vector.shape_cast %188 : vector<2x1x1x32xf32> to vector<2x32xf32>
    %190 = vector.extract_strided_slice %8 {offsets = [0, 4, 4, 0], sizes = [2, 1, 1, 32], strides = [1, 1, 1, 1]} : vector<2x8x8x32xf32> to vector<2x1x1x32xf32>
    %191 = vector.shape_cast %190 : vector<2x1x1x32xf32> to vector<2x32xf32>
    %192 = vector.extract_strided_slice %8 {offsets = [0, 4, 5, 0], sizes = [2, 1, 1, 32], strides = [1, 1, 1, 1]} : vector<2x8x8x32xf32> to vector<2x1x1x32xf32>
    %193 = vector.shape_cast %192 : vector<2x1x1x32xf32> to vector<2x32xf32>
    %194 = vector.extract_strided_slice %8 {offsets = [0, 4, 6, 0], sizes = [2, 1, 1, 32], strides = [1, 1, 1, 1]} : vector<2x8x8x32xf32> to vector<2x1x1x32xf32>
    %195 = vector.shape_cast %194 : vector<2x1x1x32xf32> to vector<2x32xf32>
    %196 = vector.extract_strided_slice %8 {offsets = [0, 4, 7, 0], sizes = [2, 1, 1, 32], strides = [1, 1, 1, 1]} : vector<2x8x8x32xf32> to vector<2x1x1x32xf32>
    %197 = vector.shape_cast %196 : vector<2x1x1x32xf32> to vector<2x32xf32>
    %198 = vector.extract_strided_slice %8 {offsets = [0, 5, 4, 0], sizes = [2, 1, 1, 32], strides = [1, 1, 1, 1]} : vector<2x8x8x32xf32> to vector<2x1x1x32xf32>
    %199 = vector.shape_cast %198 : vector<2x1x1x32xf32> to vector<2x32xf32>
    %200 = vector.extract_strided_slice %8 {offsets = [0, 5, 5, 0], sizes = [2, 1, 1, 32], strides = [1, 1, 1, 1]} : vector<2x8x8x32xf32> to vector<2x1x1x32xf32>
    %201 = vector.shape_cast %200 : vector<2x1x1x32xf32> to vector<2x32xf32>
    %202 = vector.extract_strided_slice %8 {offsets = [0, 5, 6, 0], sizes = [2, 1, 1, 32], strides = [1, 1, 1, 1]} : vector<2x8x8x32xf32> to vector<2x1x1x32xf32>
    %203 = vector.shape_cast %202 : vector<2x1x1x32xf32> to vector<2x32xf32>
    %204 = vector.extract_strided_slice %8 {offsets = [0, 5, 7, 0], sizes = [2, 1, 1, 32], strides = [1, 1, 1, 1]} : vector<2x8x8x32xf32> to vector<2x1x1x32xf32>
    %205 = vector.shape_cast %204 : vector<2x1x1x32xf32> to vector<2x32xf32>
    %206 = tpu.concatenate %175, %177, %179, %181, %183, %185, %187, %189, %191, %193, %195, %197, %199, %201, %203, %205 in 1 : vector<2x32xf32>, vector<2x32xf32>, vector<2x32xf32>, vector<2x32xf32>, vector<2x32xf32>, vector<2x32xf32>, vector<2x32xf32>, vector<2x32xf32>, vector<2x32xf32>, vector<2x32xf32>, vector<2x32xf32>, vector<2x32xf32>, vector<2x32xf32>, vector<2x32xf32>, vector<2x32xf32>, vector<2x32xf32> -> vector<2x512xf32>
    %207 = vector.extract_strided_slice %8 {offsets = [0, 4, 0, 0], sizes = [2, 1, 1, 32], strides = [1, 1, 1, 1]} : vector<2x8x8x32xf32> to vector<2x1x1x32xf32>
    %208 = vector.shape_cast %207 : vector<2x1x1x32xf32> to vector<2x32xf32>
    %209 = vector.extract_strided_slice %8 {offsets = [0, 4, 1, 0], sizes = [2, 1, 1, 32], strides = [1, 1, 1, 1]} : vector<2x8x8x32xf32> to vector<2x1x1x32xf32>
    %210 = vector.shape_cast %209 : vector<2x1x1x32xf32> to vector<2x32xf32>
    %211 = vector.extract_strided_slice %8 {offsets = [0, 4, 2, 0], sizes = [2, 1, 1, 32], strides = [1, 1, 1, 1]} : vector<2x8x8x32xf32> to vector<2x1x1x32xf32>
    %212 = vector.shape_cast %211 : vector<2x1x1x32xf32> to vector<2x32xf32>
    %213 = vector.extract_strided_slice %8 {offsets = [0, 4, 3, 0], sizes = [2, 1, 1, 32], strides = [1, 1, 1, 1]} : vector<2x8x8x32xf32> to vector<2x1x1x32xf32>
    %214 = vector.shape_cast %213 : vector<2x1x1x32xf32> to vector<2x32xf32>
    %215 = vector.extract_strided_slice %8 {offsets = [0, 5, 0, 0], sizes = [2, 1, 1, 32], strides = [1, 1, 1, 1]} : vector<2x8x8x32xf32> to vector<2x1x1x32xf32>
    %216 = vector.shape_cast %215 : vector<2x1x1x32xf32> to vector<2x32xf32>
    %217 = vector.extract_strided_slice %8 {offsets = [0, 5, 1, 0], sizes = [2, 1, 1, 32], strides = [1, 1, 1, 1]} : vector<2x8x8x32xf32> to vector<2x1x1x32xf32>
    %218 = vector.shape_cast %217 : vector<2x1x1x32xf32> to vector<2x32xf32>
    %219 = vector.extract_strided_slice %8 {offsets = [0, 5, 2, 0], sizes = [2, 1, 1, 32], strides = [1, 1, 1, 1]} : vector<2x8x8x32xf32> to vector<2x1x1x32xf32>
    %220 = vector.shape_cast %219 : vector<2x1x1x32xf32> to vector<2x32xf32>
    %221 = vector.extract_strided_slice %8 {offsets = [0, 5, 3, 0], sizes = [2, 1, 1, 32], strides = [1, 1, 1, 1]} : vector<2x8x8x32xf32> to vector<2x1x1x32xf32>
    %222 = vector.shape_cast %221 : vector<2x1x1x32xf32> to vector<2x32xf32>
    %223 = vector.extract_strided_slice %8 {offsets = [0, 6, 0, 0], sizes = [2, 1, 1, 32], strides = [1, 1, 1, 1]} : vector<2x8x8x32xf32> to vector<2x1x1x32xf32>
    %224 = vector.shape_cast %223 : vector<2x1x1x32xf32> to vector<2x32xf32>
    %225 = vector.extract_strided_slice %8 {offsets = [0, 6, 1, 0], sizes = [2, 1, 1, 32], strides = [1, 1, 1, 1]} : vector<2x8x8x32xf32> to vector<2x1x1x32xf32>
    %226 = vector.shape_cast %225 : vector<2x1x1x32xf32> to vector<2x32xf32>
    %227 = vector.extract_strided_slice %8 {offsets = [0, 6, 2, 0], sizes = [2, 1, 1, 32], strides = [1, 1, 1, 1]} : vector<2x8x8x32xf32> to vector<2x1x1x32xf32>
    %228 = vector.shape_cast %227 : vector<2x1x1x32xf32> to vector<2x32xf32>
    %229 = vector.extract_strided_slice %8 {offsets = [0, 6, 3, 0], sizes = [2, 1, 1, 32], strides = [1, 1, 1, 1]} : vector<2x8x8x32xf32> to vector<2x1x1x32xf32>
    %230 = vector.shape_cast %229 : vector<2x1x1x32xf32> to vector<2x32xf32>
    %231 = vector.extract_strided_slice %8 {offsets = [0, 7, 0, 0], sizes = [2, 1, 1, 32], strides = [1, 1, 1, 1]} : vector<2x8x8x32xf32> to vector<2x1x1x32xf32>
    %232 = vector.shape_cast %231 : vector<2x1x1x32xf32> to vector<2x32xf32>
    %233 = vector.extract_strided_slice %8 {offsets = [0, 7, 1, 0], sizes = [2, 1, 1, 32], strides = [1, 1, 1, 1]} : vector<2x8x8x32xf32> to vector<2x1x1x32xf32>
    %234 = vector.shape_cast %233 : vector<2x1x1x32xf32> to vector<2x32xf32>
    %235 = vector.extract_strided_slice %8 {offsets = [0, 7, 2, 0], sizes = [2, 1, 1, 32], strides = [1, 1, 1, 1]} : vector<2x8x8x32xf32> to vector<2x1x1x32xf32>
    %236 = vector.shape_cast %235 : vector<2x1x1x32xf32> to vector<2x32xf32>
    %237 = vector.extract_strided_slice %8 {offsets = [0, 7, 3, 0], sizes = [2, 1, 1, 32], strides = [1, 1, 1, 1]} : vector<2x8x8x32xf32> to vector<2x1x1x32xf32>
    %238 = vector.shape_cast %237 : vector<2x1x1x32xf32> to vector<2x32xf32>
    %239 = tpu.concatenate %208, %210, %212, %214, %216, %218, %220, %222, %224, %226, %228, %230, %232, %234, %236, %238 in 1 : vector<2x32xf32>, vector<2x32xf32>, vector<2x32xf32>, vector<2x32xf32>, vector<2x32xf32>, vector<2x32xf32>, vector<2x32xf32>, vector<2x32xf32>, vector<2x32xf32>, vector<2x32xf32>, vector<2x32xf32>, vector<2x32xf32>, vector<2x32xf32>, vector<2x32xf32>, vector<2x32xf32>, vector<2x32xf32> -> vector<2x512xf32>
    %240 = vector.extract_strided_slice %8 {offsets = [0, 4, 2, 0], sizes = [2, 1, 1, 32], strides = [1, 1, 1, 1]} : vector<2x8x8x32xf32> to vector<2x1x1x32xf32>
    %241 = vector.shape_cast %240 : vector<2x1x1x32xf32> to vector<2x32xf32>
    %242 = vector.extract_strided_slice %8 {offsets = [0, 4, 3, 0], sizes = [2, 1, 1, 32], strides = [1, 1, 1, 1]} : vector<2x8x8x32xf32> to vector<2x1x1x32xf32>
    %243 = vector.shape_cast %242 : vector<2x1x1x32xf32> to vector<2x32xf32>
    %244 = vector.extract_strided_slice %8 {offsets = [0, 4, 4, 0], sizes = [2, 1, 1, 32], strides = [1, 1, 1, 1]} : vector<2x8x8x32xf32> to vector<2x1x1x32xf32>
    %245 = vector.shape_cast %244 : vector<2x1x1x32xf32> to vector<2x32xf32>
    %246 = vector.extract_strided_slice %8 {offsets = [0, 4, 5, 0], sizes = [2, 1, 1, 32], strides = [1, 1, 1, 1]} : vector<2x8x8x32xf32> to vector<2x1x1x32xf32>
    %247 = vector.shape_cast %246 : vector<2x1x1x32xf32> to vector<2x32xf32>
    %248 = vector.extract_strided_slice %8 {offsets = [0, 5, 2, 0], sizes = [2, 1, 1, 32], strides = [1, 1, 1, 1]} : vector<2x8x8x32xf32> to vector<2x1x1x32xf32>
    %249 = vector.shape_cast %248 : vector<2x1x1x32xf32> to vector<2x32xf32>
    %250 = vector.extract_strided_slice %8 {offsets = [0, 5, 3, 0], sizes = [2, 1, 1, 32], strides = [1, 1, 1, 1]} : vector<2x8x8x32xf32> to vector<2x1x1x32xf32>
    %251 = vector.shape_cast %250 : vector<2x1x1x32xf32> to vector<2x32xf32>
    %252 = vector.extract_strided_slice %8 {offsets = [0, 5, 4, 0], sizes = [2, 1, 1, 32], strides = [1, 1, 1, 1]} : vector<2x8x8x32xf32> to vector<2x1x1x32xf32>
    %253 = vector.shape_cast %252 : vector<2x1x1x32xf32> to vector<2x32xf32>
    %254 = vector.extract_strided_slice %8 {offsets = [0, 5, 5, 0], sizes = [2, 1, 1, 32], strides = [1, 1, 1, 1]} : vector<2x8x8x32xf32> to vector<2x1x1x32xf32>
    %255 = vector.shape_cast %254 : vector<2x1x1x32xf32> to vector<2x32xf32>
    %256 = vector.extract_strided_slice %8 {offsets = [0, 6, 2, 0], sizes = [2, 1, 1, 32], strides = [1, 1, 1, 1]} : vector<2x8x8x32xf32> to vector<2x1x1x32xf32>
    %257 = vector.shape_cast %256 : vector<2x1x1x32xf32> to vector<2x32xf32>
    %258 = vector.extract_strided_slice %8 {offsets = [0, 6, 3, 0], sizes = [2, 1, 1, 32], strides = [1, 1, 1, 1]} : vector<2x8x8x32xf32> to vector<2x1x1x32xf32>
    %259 = vector.shape_cast %258 : vector<2x1x1x32xf32> to vector<2x32xf32>
    %260 = vector.extract_strided_slice %8 {offsets = [0, 6, 4, 0], sizes = [2, 1, 1, 32], strides = [1, 1, 1, 1]} : vector<2x8x8x32xf32> to vector<2x1x1x32xf32>
    %261 = vector.shape_cast %260 : vector<2x1x1x32xf32> to vector<2x32xf32>
    %262 = vector.extract_strided_slice %8 {offsets = [0, 6, 5, 0], sizes = [2, 1, 1, 32], strides = [1, 1, 1, 1]} : vector<2x8x8x32xf32> to vector<2x1x1x32xf32>
    %263 = vector.shape_cast %262 : vector<2x1x1x32xf32> to vector<2x32xf32>
    %264 = vector.extract_strided_slice %8 {offsets = [0, 7, 2, 0], sizes = [2, 1, 1, 32], strides = [1, 1, 1, 1]} : vector<2x8x8x32xf32> to vector<2x1x1x32xf32>
    %265 = vector.shape_cast %264 : vector<2x1x1x32xf32> to vector<2x32xf32>
    %266 = vector.extract_strided_slice %8 {offsets = [0, 7, 3, 0], sizes = [2, 1, 1, 32], strides = [1, 1, 1, 1]} : vector<2x8x8x32xf32> to vector<2x1x1x32xf32>
    %267 = vector.shape_cast %266 : vector<2x1x1x32xf32> to vector<2x32xf32>
    %268 = vector.extract_strided_slice %8 {offsets = [0, 7, 4, 0], sizes = [2, 1, 1, 32], strides = [1, 1, 1, 1]} : vector<2x8x8x32xf32> to vector<2x1x1x32xf32>
    %269 = vector.shape_cast %268 : vector<2x1x1x32xf32> to vector<2x32xf32>
    %270 = vector.extract_strided_slice %8 {offsets = [0, 7, 5, 0], sizes = [2, 1, 1, 32], strides = [1, 1, 1, 1]} : vector<2x8x8x32xf32> to vector<2x1x1x32xf32>
    %271 = vector.shape_cast %270 : vector<2x1x1x32xf32> to vector<2x32xf32>
    %272 = tpu.concatenate %241, %243, %245, %247, %249, %251, %253, %255, %257, %259, %261, %263, %265, %267, %269, %271 in 1 : vector<2x32xf32>, vector<2x32xf32>, vector<2x32xf32>, vector<2x32xf32>, vector<2x32xf32>, vector<2x32xf32>, vector<2x32xf32>, vector<2x32xf32>, vector<2x32xf32>, vector<2x32xf32>, vector<2x32xf32>, vector<2x32xf32>, vector<2x32xf32>, vector<2x32xf32>, vector<2x32xf32>, vector<2x32xf32> -> vector<2x512xf32>
    %273 = vector.extract_strided_slice %8 {offsets = [0, 4, 4, 0], sizes = [2, 1, 1, 32], strides = [1, 1, 1, 1]} : vector<2x8x8x32xf32> to vector<2x1x1x32xf32>
    %274 = vector.shape_cast %273 : vector<2x1x1x32xf32> to vector<2x32xf32>
    %275 = vector.extract_strided_slice %8 {offsets = [0, 4, 5, 0], sizes = [2, 1, 1, 32], strides = [1, 1, 1, 1]} : vector<2x8x8x32xf32> to vector<2x1x1x32xf32>
    %276 = vector.shape_cast %275 : vector<2x1x1x32xf32> to vector<2x32xf32>
    %277 = vector.extract_strided_slice %8 {offsets = [0, 4, 6, 0], sizes = [2, 1, 1, 32], strides = [1, 1, 1, 1]} : vector<2x8x8x32xf32> to vector<2x1x1x32xf32>
    %278 = vector.shape_cast %277 : vector<2x1x1x32xf32> to vector<2x32xf32>
    %279 = vector.extract_strided_slice %8 {offsets = [0, 4, 7, 0], sizes = [2, 1, 1, 32], strides = [1, 1, 1, 1]} : vector<2x8x8x32xf32> to vector<2x1x1x32xf32>
    %280 = vector.shape_cast %279 : vector<2x1x1x32xf32> to vector<2x32xf32>
    %281 = vector.extract_strided_slice %8 {offsets = [0, 5, 4, 0], sizes = [2, 1, 1, 32], strides = [1, 1, 1, 1]} : vector<2x8x8x32xf32> to vector<2x1x1x32xf32>
    %282 = vector.shape_cast %281 : vector<2x1x1x32xf32> to vector<2x32xf32>
    %283 = vector.extract_strided_slice %8 {offsets = [0, 5, 5, 0], sizes = [2, 1, 1, 32], strides = [1, 1, 1, 1]} : vector<2x8x8x32xf32> to vector<2x1x1x32xf32>
    %284 = vector.shape_cast %283 : vector<2x1x1x32xf32> to vector<2x32xf32>
    %285 = vector.extract_strided_slice %8 {offsets = [0, 5, 6, 0], sizes = [2, 1, 1, 32], strides = [1, 1, 1, 1]} : vector<2x8x8x32xf32> to vector<2x1x1x32xf32>
    %286 = vector.shape_cast %285 : vector<2x1x1x32xf32> to vector<2x32xf32>
    %287 = vector.extract_strided_slice %8 {offsets = [0, 5, 7, 0], sizes = [2, 1, 1, 32], strides = [1, 1, 1, 1]} : vector<2x8x8x32xf32> to vector<2x1x1x32xf32>
    %288 = vector.shape_cast %287 : vector<2x1x1x32xf32> to vector<2x32xf32>
    %289 = vector.extract_strided_slice %8 {offsets = [0, 6, 4, 0], sizes = [2, 1, 1, 32], strides = [1, 1, 1, 1]} : vector<2x8x8x32xf32> to vector<2x1x1x32xf32>
    %290 = vector.shape_cast %289 : vector<2x1x1x32xf32> to vector<2x32xf32>
    %291 = vector.extract_strided_slice %8 {offsets = [0, 6, 5, 0], sizes = [2, 1, 1, 32], strides = [1, 1, 1, 1]} : vector<2x8x8x32xf32> to vector<2x1x1x32xf32>
    %292 = vector.shape_cast %291 : vector<2x1x1x32xf32> to vector<2x32xf32>
    %293 = vector.extract_strided_slice %8 {offsets = [0, 6, 6, 0], sizes = [2, 1, 1, 32], strides = [1, 1, 1, 1]} : vector<2x8x8x32xf32> to vector<2x1x1x32xf32>
    %294 = vector.shape_cast %293 : vector<2x1x1x32xf32> to vector<2x32xf32>
    %295 = vector.extract_strided_slice %8 {offsets = [0, 6, 7, 0], sizes = [2, 1, 1, 32], strides = [1, 1, 1, 1]} : vector<2x8x8x32xf32> to vector<2x1x1x32xf32>
    %296 = vector.shape_cast %295 : vector<2x1x1x32xf32> to vector<2x32xf32>
    %297 = vector.extract_strided_slice %8 {offsets = [0, 7, 4, 0], sizes = [2, 1, 1, 32], strides = [1, 1, 1, 1]} : vector<2x8x8x32xf32> to vector<2x1x1x32xf32>
    %298 = vector.shape_cast %297 : vector<2x1x1x32xf32> to vector<2x32xf32>
    %299 = vector.extract_strided_slice %8 {offsets = [0, 7, 5, 0], sizes = [2, 1, 1, 32], strides = [1, 1, 1, 1]} : vector<2x8x8x32xf32> to vector<2x1x1x32xf32>
    %300 = vector.shape_cast %299 : vector<2x1x1x32xf32> to vector<2x32xf32>
    %301 = vector.extract_strided_slice %8 {offsets = [0, 7, 6, 0], sizes = [2, 1, 1, 32], strides = [1, 1, 1, 1]} : vector<2x8x8x32xf32> to vector<2x1x1x32xf32>
    %302 = vector.shape_cast %301 : vector<2x1x1x32xf32> to vector<2x32xf32>
    %303 = vector.extract_strided_slice %8 {offsets = [0, 7, 7, 0], sizes = [2, 1, 1, 32], strides = [1, 1, 1, 1]} : vector<2x8x8x32xf32> to vector<2x1x1x32xf32>
    %304 = vector.shape_cast %303 : vector<2x1x1x32xf32> to vector<2x32xf32>
    %305 = tpu.concatenate %274, %276, %278, %280, %282, %284, %286, %288, %290, %292, %294, %296, %298, %300, %302, %304 in 1 : vector<2x32xf32>, vector<2x32xf32>, vector<2x32xf32>, vector<2x32xf32>, vector<2x32xf32>, vector<2x32xf32>, vector<2x32xf32>, vector<2x32xf32>, vector<2x32xf32>, vector<2x32xf32>, vector<2x32xf32>, vector<2x32xf32>, vector<2x32xf32>, vector<2x32xf32>, vector<2x32xf32>, vector<2x32xf32> -> vector<2x512xf32>
    %306 = tpu.concatenate %41, %74, %107, %140, %173, %206, %239, %272, %305 in 0 : vector<2x512xf32>, vector<2x512xf32>, vector<2x512xf32>, vector<2x512xf32>, vector<2x512xf32>, vector<2x512xf32>, vector<2x512xf32>, vector<2x512xf32>, vector<2x512xf32> -> vector<18x512xf32>
    %307 = arith.truncf %306 : vector<18x512xf32> to vector<18x512xbf16>
    %c0_6 = arith.constant 0 : index
    %c0_7 = arith.constant 0 : index
    %308 = vector.load %arg4[%c0_6, %c0_7] : memref<512x64xbf16, #tpu.memory_space<vmem>>, vector<512x64xbf16>
    %cst_8 = arith.constant dense<0.000000e+00> : vector<18x64xf32>
    %309 = tpu.matmul %307, %308, %cst_8 {dimension_numbers = #tpu.dot_dimension_numbers<[1], [0], [0], [1], [0, 0, 1, 1], [], []>} : vector<18x512xbf16>, vector<512x64xbf16>, vector<18x64xf32> -> vector<18x64xf32>
    %c0_9 = arith.constant 0 : index
    %c0_10 = arith.constant 0 : index
    %310 = vector.load %arg5[%c0_9, %c0_10] : memref<1x64xf32, #tpu.memory_space<vmem>>, vector<1x64xf32>
    %311 = vector.broadcast %310 : vector<1x64xf32> to vector<18x64xf32>
    %312 = arith.addf %309, %311 : vector<18x64xf32>
    %cst_11 = arith.constant 0.000000e+00 : f32
    %313 = vector.broadcast %cst_11 : f32 to vector<18x64xf32>
    %314 = arith.maximumf %312, %313 : vector<18x64xf32>
    %315 = vector.extract_strided_slice %314 {offsets = [0, 0], sizes = [2, 64], strides = [1, 1]} : vector<18x64xf32> to vector<2x64xf32>
    %316 = vector.extract_strided_slice %314 {offsets = [2, 0], sizes = [2, 64], strides = [1, 1]} : vector<18x64xf32> to vector<2x64xf32>
    %317 = vector.extract_strided_slice %314 {offsets = [4, 0], sizes = [2, 64], strides = [1, 1]} : vector<18x64xf32> to vector<2x64xf32>
    %318 = vector.extract_strided_slice %314 {offsets = [6, 0], sizes = [2, 64], strides = [1, 1]} : vector<18x64xf32> to vector<2x64xf32>
    %319 = vector.extract_strided_slice %314 {offsets = [8, 0], sizes = [2, 64], strides = [1, 1]} : vector<18x64xf32> to vector<2x64xf32>
    %320 = vector.extract_strided_slice %314 {offsets = [10, 0], sizes = [2, 64], strides = [1, 1]} : vector<18x64xf32> to vector<2x64xf32>
    %321 = vector.extract_strided_slice %314 {offsets = [12, 0], sizes = [2, 64], strides = [1, 1]} : vector<18x64xf32> to vector<2x64xf32>
    %322 = vector.extract_strided_slice %314 {offsets = [14, 0], sizes = [2, 64], strides = [1, 1]} : vector<18x64xf32> to vector<2x64xf32>
    %323 = vector.extract_strided_slice %314 {offsets = [16, 0], sizes = [2, 64], strides = [1, 1]} : vector<18x64xf32> to vector<2x64xf32>
    %324 = tpu.concatenate %315, %316, %317, %318, %319, %320, %321, %322, %323 in 1 : vector<2x64xf32>, vector<2x64xf32>, vector<2x64xf32>, vector<2x64xf32>, vector<2x64xf32>, vector<2x64xf32>, vector<2x64xf32>, vector<2x64xf32>, vector<2x64xf32> -> vector<2x576xf32>
    %325 = arith.truncf %324 : vector<2x576xf32> to vector<2x576xbf16>
    %c0_12 = arith.constant 0 : index
    %c0_13 = arith.constant 0 : index
    %326 = vector.load %arg6[%c0_12, %c0_13] : memref<576x64xbf16, #tpu.memory_space<vmem>>, vector<576x64xbf16>
    %cst_14 = arith.constant dense<0.000000e+00> : vector<2x64xf32>
    %327 = tpu.matmul %325, %326, %cst_14 {dimension_numbers = #tpu.dot_dimension_numbers<[1], [0], [0], [1], [0, 0, 1, 1], [], []>} : vector<2x576xbf16>, vector<576x64xbf16>, vector<2x64xf32> -> vector<2x64xf32>
    %c0_15 = arith.constant 0 : index
    %c0_16 = arith.constant 0 : index
    %328 = vector.load %arg7[%c0_15, %c0_16] : memref<1x64xf32, #tpu.memory_space<vmem>>, vector<1x64xf32>
    %329 = vector.broadcast %328 : vector<1x64xf32> to vector<2x64xf32>
    %330 = arith.addf %327, %329 : vector<2x64xf32>
    %cst_17 = arith.constant 0.000000e+00 : f32
    %331 = vector.broadcast %cst_17 : f32 to vector<2x64xf32>
    %332 = arith.maximumf %330, %331 : vector<2x64xf32>
    %333 = arith.truncf %332 : vector<2x64xf32> to vector<2x64xbf16>
    %c0_18 = arith.constant 0 : index
    %c0_19 = arith.constant 0 : index
    %334 = vector.load %arg8[%c0_18, %c0_19] : memref<64x256xbf16, #tpu.memory_space<vmem>>, vector<64x256xbf16>
    %cst_20 = arith.constant dense<0.000000e+00> : vector<2x256xf32>
    %335 = tpu.matmul %333, %334, %cst_20 {dimension_numbers = #tpu.dot_dimension_numbers<[1], [0], [0], [1], [0, 0, 1, 1], [], []>} : vector<2x64xbf16>, vector<64x256xbf16>, vector<2x256xf32> -> vector<2x256xf32>
    %c0_21 = arith.constant 0 : index
    %c0_22 = arith.constant 0 : index
    %336 = vector.load %arg9[%c0_21, %c0_22] : memref<1x256xf32, #tpu.memory_space<vmem>>, vector<1x256xf32>
    %337 = vector.broadcast %336 : vector<1x256xf32> to vector<2x256xf32>
    %338 = arith.addf %335, %337 : vector<2x256xf32>
    %cst_23 = arith.constant 0.000000e+00 : f32
    %339 = vector.broadcast %cst_23 : f32 to vector<2x256xf32>
    %340 = arith.maximumf %338, %339 : vector<2x256xf32>
    %341 = arith.truncf %340 : vector<2x256xf32> to vector<2x256xbf16>
    %c0_24 = arith.constant 0 : index
    %c0_25 = arith.constant 0 : index
    %342 = vector.load %arg10[%c0_24, %c0_25] : memref<256x128xbf16, #tpu.memory_space<vmem>>, vector<256x128xbf16>
    %cst_26 = arith.constant dense<0.000000e+00> : vector<2x128xf32>
    %343 = tpu.matmul %341, %342, %cst_26 {dimension_numbers = #tpu.dot_dimension_numbers<[1], [0], [0], [1], [0, 0, 1, 1], [], []>} : vector<2x256xbf16>, vector<256x128xbf16>, vector<2x128xf32> -> vector<2x128xf32>
    %c0_27 = arith.constant 0 : index
    %c0_28 = arith.constant 0 : index
    %344 = vector.load %arg11[%c0_27, %c0_28] : memref<1x128xf32, #tpu.memory_space<vmem>>, vector<1x128xf32>
    %345 = vector.broadcast %344 : vector<1x128xf32> to vector<2x128xf32>
    %346 = arith.addf %343, %345 : vector<2x128xf32>
    %c0_29 = arith.constant 0 : index
    %c0_30 = arith.constant 0 : index
    %347 = vector.load %arg12[%c0_29, %c0_30] : memref<2x128xf32, #tpu.memory_space<vmem>>, vector<2x128xf32>
    tpu.vector_store %arg12[%c0_29, %c0_30], %346 {strides = array<i32>} : memref<2x128xf32, #tpu.memory_space<vmem>>, vector<2x128xf32>,
    return
  }
  func.func @transform_0(%arg0: i32) -> (i32, i32) {
    %c0_i32 = arith.constant 0 : i32
    %c0_i32_0 = arith.constant 0 : i32
    return %arg0, %c0_i32 : i32, i32
  }
  func.func @transform_1(%arg0: i32) -> (i32, i32) {
    %c0_i32 = arith.constant 0 : i32
    %c0_i32_0 = arith.constant 0 : i32
    %c0_i32_1 = arith.constant 0 : i32
    return %c0_i32, %c0_i32_0 : i32, i32
  }
  func.func @transform_2(%arg0: i32) -> (i32, i32) {
    %c0_i32 = arith.constant 0 : i32
    %c0_i32_0 = arith.constant 0 : i32
    %c0_i32_1 = arith.constant 0 : i32
    return %c0_i32, %c0_i32_0 : i32, i32
  }
  func.func @transform_3(%arg0: i32) -> (i32, i32) {
    %c0_i32 = arith.constant 0 : i32
    %c0_i32_0 = arith.constant 0 : i32
    %c0_i32_1 = arith.constant 0 : i32
    return %c0_i32, %c0_i32_0 : i32, i32
  }
  func.func @transform_4(%arg0: i32) -> (i32, i32) {
    %c0_i32 = arith.constant 0 : i32
    %c0_i32_0 = arith.constant 0 : i32
    %c0_i32_1 = arith.constant 0 : i32
    return %c0_i32, %c0_i32_0 : i32, i32
  }
  func.func @transform_5(%arg0: i32) -> (i32, i32) {
    %c0_i32 = arith.constant 0 : i32
    %c0_i32_0 = arith.constant 0 : i32
    %c0_i32_1 = arith.constant 0 : i32
    return %c0_i32, %c0_i32_0 : i32, i32
  }
  func.func @transform_6(%arg0: i32) -> (i32, i32) {
    %c0_i32 = arith.constant 0 : i32
    %c0_i32_0 = arith.constant 0 : i32
    %c0_i32_1 = arith.constant 0 : i32
    return %c0_i32, %c0_i32_0 : i32, i32
  }
  func.func @transform_7(%arg0: i32) -> (i32, i32) {
    %c0_i32 = arith.constant 0 : i32
    %c0_i32_0 = arith.constant 0 : i32
    %c0_i32_1 = arith.constant 0 : i32
    return %c0_i32, %c0_i32_0 : i32, i32
  }
  func.func @transform_8(%arg0: i32) -> (i32, i32) {
    %c0_i32 = arith.constant 0 : i32
    %c0_i32_0 = arith.constant 0 : i32
    %c0_i32_1 = arith.constant 0 : i32
    return %c0_i32, %c0_i32_0 : i32, i32
  }
  func.func @transform_9(%arg0: i32) -> (i32, i32) {
    %c0_i32 = arith.constant 0 : i32
    %c0_i32_0 = arith.constant 0 : i32
    %c0_i32_1 = arith.constant 0 : i32
    return %c0_i32, %c0_i32_0 : i32, i32
  }
  func.func @transform_10(%arg0: i32) -> (i32, i32) {
    %c0_i32 = arith.constant 0 : i32
    %c0_i32_0 = arith.constant 0 : i32
    %c0_i32_1 = arith.constant 0 : i32
    return %c0_i32, %c0_i32_0 : i32, i32
  }
  func.func @transform_11(%arg0: i32) -> (i32, i32) {
    %c0_i32 = arith.constant 0 : i32
    %c0_i32_0 = arith.constant 0 : i32
    return %arg0, %c0_i32 : i32, i32
  }
}

</mosaic_0001>

<bundles_post_ra>
// kernel: convolution_nn_forward.1
= control target key start
LH: loop header
LB: loop body
LE: loop exit
PB: predicated region body
PF: predicated region fallthrough
CT: control target
= control target key end

     0   :  { %s3991_s0 = inlined_call_operand.vmem [shape: bf16[128,256], index: 0, kind: input, shape index: {}]   ;;  %s3992_s1 = inlined_call_operand.vmem [shape: bf16[256,32], index: 1, kind: input, shape index: {}]   ;;  %s3993_s2 = inlined_call_operand.vmem [shape: f32[1,32], index: 2, kind: input, shape index: {}]   ;;  %s3994_s3 = inlined_call_operand.vmem [shape: bf16[512,64], index: 3, kind: input, shape index: {}]   ;;  %s3995_s4 = inlined_call_operand.vmem [shape: f32[1,64], index: 4, kind: input, shape index: {}]   ;;  %s3996_s5 = inlined_call_operand.vmem [shape: bf16[576,64], index: 5, kind: input, shape index: {}]   ;;  %s3997_s6 = inlined_call_operand.vmem [shape: f32[1,64], index: 6, kind: input, shape index: {}]   ;;  %s3998_s7 = inlined_call_operand.vmem [shape: bf16[64,256], index: 7, kind: input, shape index: {}]   ;;  %s3999_s8 = inlined_call_operand.vmem [shape: f32[1,256], index: 8, kind: input, shape index: {}]   ;;  %s4000_s9 = inlined_call_operand.vmem [shape: bf16[256,128], index: 9, kind: input, shape index: {}]   ;;  %s4001_s10 = inlined_call_operand.vmem [shape: f32[1,128], index: 10, kind: input, shape index: {}]   ;;  %s4002_s11 = inlined_call_operand.hbm [shape: f32[2,128], index: 11, kind: output, shape index: {}]  }
   0x1   :  { %v2473_v0 = vld [vmem:[%s3992_s1 + $0x38] sm:$0xff]  ;;  %v2472_v2 = vld [vmem:[%s3992_s1 + $0x30] sm:$0xff]  ;;  %v2471_v4 = vld [vmem:[%s3992_s1 + $0x28] sm:$0xff] }
   0x2   :  { %v2481_v1 = vld [vmem:[%s3992_s1 + $0x78] sm:$0xff]  ;;  %268 = vmatpush.bf16.msra.mxu0 %v2473_v0  ;;  %v2480_v3 = vld [vmem:[%s3992_s1 + $0x70] sm:$0xff]  ;;  %v2479_v5 = vld [vmem:[%s3992_s1 + $0x68] sm:$0xff] }
   0x3   :  { %317 = vmatpush.bf16.msra.mxu1 %v2481_v1 }
   0x6   :  { %269 = vmatpush.bf16.msra.mxu0 %v2472_v2 }
   0x7   :  { %318 = vmatpush.bf16.msra.mxu1 %v2480_v3 }
   0x8   :  { %16 = vsyncpa [#allocation3], 0  ;;  %v2470_v6 = vld [vmem:[%s3992_s1 + $0x20] sm:$0xff]  ;;  %v2469_v8 = vld [vmem:[%s3992_s1 + $0x18] sm:$0xff]  ;;  %vm486_vm0 = vcmask 1043459   ;;  %vm555_vm1 = vcmask 1045509  }
   0x9   :  { %v2478_v7 = vld [vmem:[%s3992_s1 + $0x60] sm:$0xff]  ;;  %v2477_v9 = vld [vmem:[%s3992_s1 + $0x58] sm:$0xff]  ;;  %v2468_v10 = vld [vmem:[%s3992_s1 + $0x10] sm:$0xff]  ;;  %vm385_vm2 = vcmask 1041409   ;;  %s2790_s17 = smov 64   ;;  %vm471_vm3 = vcmask 261120  }
   0xa   :  { %270 = vmatpush.bf16.msra.mxu0 %v2471_v4  ;;  %v2476_v11 = vld [vmem:[%s3992_s1 + $0x50] sm:$0xff]  ;;  %v2467_v12 = vld [vmem:[%s3992_s1 + $0x8] sm:$0xff]  ;;  %v2466_v14 = vld [vmem:[%s3992_s1] sm:$0xff]  ;;  %vm473_vm4 = vcmask 523264   ;;  %vm475_vm5 = vcmask 785408   ;;  %vm926_vm6 = vcmask 1041408  }
   0xb   :  { %319 = vmatpush.bf16.msra.mxu1 %v2479_v5  ;;  %v2475_v13 = vld [vmem:[%s3992_s1 + $0x48] sm:$0xff]  ;;  %v2474_v15 = vld [vmem:[%s3992_s1 + $0x40] sm:$0xff]  ;;  %v1961_v22 = vld [vmem:[%s3991_s0 + $0x10] sm:$0xf]  ;;  %vm931_vm7 = vcmask 1043456   ;;  %vm936_vm8 = vcmask 1045504  }
   0xc   :  { %v1953_v16 = vld [vmem:[%s3991_s0] sm:$0xf]  ;;  %v2451_v17 = vld [vmem:[%s3991_s0 + $0x4] sm:$0xf0]  ;;  %v2450_v18 = vld [vmem:[%s3991_s0 + $0x4] sm:$0xf] }
   0xd   :  { %v1955_v19 = vld [vmem:[%s3991_s0 + $0x8] sm:$0xf0]  ;;  %v1954_v20 = vor.u32 %v2451_v17, %v1953_v16  ;;  %v2453_v23 = vld [vmem:[%s3991_s0 + $0x14] sm:$0xf0]  ;;  %v2452_v24 = vld [vmem:[%s3991_s0 + $0x14] sm:$0xf] }
   0xe   :  { %271 = vmatpush.bf16.msra.mxu0 %v2470_v6  ;;  %v1958_v21 = vor.u32 %v2450_v18, %v1955_v19  ;;  %v1963_v25 = vld [vmem:[%s3991_s0 + $0x18] sm:$0xf0]  ;;  %v1962_v26 = vor.u32 %v2453_v23, %v1961_v22  ;;  %v1969_v28 = vld [vmem:[%s3991_s0 + $0x20] sm:$0xf]  ;;  %v2455_v29 = vld [vmem:[%s3991_s0 + $0x24] sm:$0xf0] }
   0xf   :  { %320 = vmatpush.bf16.msra.mxu1 %v2478_v7  ;;  %v1966_v27 = vor.u32 %v2452_v24, %v1963_v25  ;;  %v2454_v30 = vld [vmem:[%s3991_s0 + $0x24] sm:$0xf]  ;;  %v1971_v31 = vld [vmem:[%s3991_s0 + $0x28] sm:$0xf0]  ;;  %v1970_v32 = vor.u32 %v2455_v29, %v1969_v28  ;;  %v1977_v34 = vld [vmem:[%s3991_s0 + $0x30] sm:$0xf] }
  0x10   :  { %v1974_v33 = vor.u32 %v2454_v30, %v1971_v31  ;;  %v2457_v35 = vld [vmem:[%s3991_s0 + $0x34] sm:$0xf0]  ;;  %v2456_v36 = vld [vmem:[%s3991_s0 + $0x34] sm:$0xf]  ;;  %v1979_v37 = vld [vmem:[%s3991_s0 + $0x38] sm:$0xf0] }
  0x11   :  { %v1978_v38 = vor.u32 %v2457_v35, %v1977_v34  ;;  %v1982_v39 = vor.u32 %v2456_v36, %v1979_v37  ;;  %v1985_v40 = vld [vmem:[%s3991_s0 + $0x40] sm:$0xf]  ;;  %v2459_v41 = vld [vmem:[%s3991_s0 + $0x44] sm:$0xf0]  ;;  %v2458_v42 = vld [vmem:[%s3991_s0 + $0x44] sm:$0xf] }
  0x12   :  { %272 = vmatpush.bf16.msra.mxu0 %v2469_v8  ;;  %v1987_v43 = vld [vmem:[%s3991_s0 + $0x48] sm:$0xf0]  ;;  %v1986_v44 = vor.u32 %v2459_v41, %v1985_v40  ;;  %v1993_v46 = vld [vmem:[%s3991_s0 + $0x50] sm:$0xf]  ;;  %v2461_v47 = vld [vmem:[%s3991_s0 + $0x54] sm:$0xf0] }
  0x13   :  { %321 = vmatpush.bf16.msra.mxu1 %v2477_v9  ;;  %v1990_v45 = vor.u32 %v2458_v42, %v1987_v43  ;;  %v2460_v48 = vld [vmem:[%s3991_s0 + $0x54] sm:$0xf]  ;;  %v1995_v49 = vld [vmem:[%s3991_s0 + $0x58] sm:$0xf0]  ;;  %v1994_v50 = vor.u32 %v2461_v47, %v1993_v46  ;;  %v2001_v52 = vld [vmem:[%s3991_s0 + $0x60] sm:$0xf] }
  0x14   :  { %v1998_v51 = vor.u32 %v2460_v48, %v1995_v49  ;;  %v2463_v53 = vld [vmem:[%s3991_s0 + $0x64] sm:$0xf0]  ;;  %v2462_v54 = vld [vmem:[%s3991_s0 + $0x64] sm:$0xf]  ;;  %v2003_v55 = vld [vmem:[%s3991_s0 + $0x68] sm:$0xf0] }
  0x15   :  { %v2002_v56 = vor.u32 %v2463_v53, %v2001_v52  ;;  %v2006_v57 = vor.u32 %v2462_v54, %v2003_v55  ;;  %v2009_v58 = vld [vmem:[%s3991_s0 + $0x70] sm:$0xf]  ;;  %v2465_v59 = vld [vmem:[%s3991_s0 + $0x74] sm:$0xf0]  ;;  %v2464_v60 = vld [vmem:[%s3991_s0 + $0x74] sm:$0xf] }
  0x16   :  { %273 = vmatpush.bf16.msra.mxu0 %v2468_v10  ;;  %v2011_v61 = vld [vmem:[%s3991_s0 + $0x78] sm:$0xf0]  ;;  %v2010_v62 = vor.u32 %v2465_v59, %v2009_v58  ;;  %v2999_v0 = vld [vmem:[%s3993_s2] ss:$0 sm:$0xff]  ;;  %s2788_s0 = smov 32   ;;  %s2789_s2 = smov 96  }
  0x17   :  { %322 = vmatpush.bf16.msra.mxu1 %v2476_v11  ;;  %v2014_v63 = vor.u32 %v2464_v60, %v2011_v61 }
  0x1a   :  { %274 = vmatpush.bf16.msra.mxu0 %v2467_v12 }
  0x1b   :  { %323 = vmatpush.bf16.msra.mxu1 %v2475_v13 }
  0x1e   :  { %275 = vmatpush.bf16.msra.mxu0 %v2466_v14 }
  0x1f   :  { %324 = vmatpush.bf16.msra.mxu1 %v2474_v15 }
  0x21   :  { %276 = vmatmul.bf16.vlgmr.msra.gmra.mxu0 %v1954_v20 }
  0x22   :  { %325 = vmatmul.bf16.vlgmr.msra.gmra.mxu1 %v1958_v21 }
  0x31   :  { %281 = vmatmul.bf16.gmra.mxu0 %v1962_v26 }
  0x32   :  { %330 = vmatmul.bf16.gmra.mxu1 %v1966_v27 }
  0x41   :  { %286 = vmatmul.bf16.gmra.mxu0 %v1970_v32 }
  0x42   :  { %335 = vmatmul.bf16.gmra.mxu1 %v1974_v33 }
  0x51   :  { %291 = vmatmul.bf16.gmra.mxu0 %v1978_v38 }
  0x52   :  { %340 = vmatmul.bf16.gmra.mxu1 %v1982_v39 }
  0x61   :  { %296 = vmatmul.bf16.gmra.mxu0 %v1986_v44 }
  0x62   :  { %345 = vmatmul.bf16.gmra.mxu1 %v1990_v45 }
  0x71   :  { %301 = vmatmul.bf16.gmra.mxu0 %v1994_v50 }
  0x72   :  { %350 = vmatmul.bf16.gmra.mxu1 %v1998_v51 }
  0x81   :  { %306 = vmatmul.bf16.gmra.mxu0 %v2002_v56 }
  0x82   :  { %355 = vmatmul.bf16.gmra.mxu1 %v2006_v57 }
  0x91   :  { %311 = vmatmul.bf16.gmra.mxu0 %v2010_v62 }
  0x92   :  { %360 = vmatmul.bf16.gmra.mxu1 %v2014_v63 }
  0x9e   :  { %v277_v1 = vpop.f32.mrf.mxu0 }
  0x9f   :  { %v326_v2 = vpop.f32.mrf.mxu1  ;;  %v278_v3 = vadd.f32 %v2999_v0, %v277_v1 }
  0xa1   :  { %v327_v4 = vadd.f32 %v326_v2, %v278_v3 }
  0xa3   :  { %v3021_v36 = vmax.f32 %v327_v4, 0.0 }
  0xa5   :  { %v3057_v58 = vrot.slane %v3021_v36, 1 }
  0xa6   :  { %v279_v5 = vpop.f32.mrf.mxu0 }
  0xa7   :  { %v328_v6 = vpop.f32.mrf.mxu1  ;;  %v280_v7 = vadd.f32 %v2999_v0, %v279_v5 }
  0xa9   :  { %v329_v8 = vadd.f32 %v328_v6, %v280_v7 }
  0xab   :  { %v3040_v48 = vmax.f32 %v329_v8, 0.0 }
  0xae   :  { %v282_v9 = vpop.f32.mrf.mxu0 }
  0xaf   :  { %v331_v10 = vpop.f32.mrf.mxu1  ;;  %v283_v40 = vadd.f32 %v2999_v0, %v282_v9 }
  0xb1   :  { %v332_v46 = vadd.f32 %v331_v10, %v283_v40 }
  0xb3   :  { %v368_v52 = vmax.f32 %v332_v46, 0.0 }
  0xb5   :  { %v432_v60 = vrot.slane %v368_v52, 1  ;;  %v443_v62 = vrot.slane %v368_v52, 3 }
  0xb6   :  { %v284_v11 = vpop.f32.mrf.mxu0 }
  0xb7   :  { %v333_v12 = vpop.f32.mrf.mxu1  ;;  %v285_v13 = vadd.f32 %v2999_v0, %v284_v11 }
  0xb9   :  { %v3004_v14 = vadd.f32 %v333_v12, %v285_v13 }
  0xbe   :  { %v287_v15 = vpop.f32.mrf.mxu0 }
  0xbf   :  { %v336_v16 = vpop.f32.mrf.mxu1  ;;  %v288_v17 = vadd.f32 %v2999_v0, %v287_v15 }
  0xc1   :  { %v3007_v18 = vadd.f32 %v336_v16, %v288_v17  ;;  %v437_v16 = vrot.slane %v368_v52, 2  ;;  %v3071_v17 = vrot.slane %v3021_v36, 3 }
  0xc6   :  { %v289_v19 = vpop.f32.mrf.mxu0 }
  0xc7   :  { %v338_v20 = vpop.f32.mrf.mxu1  ;;  %v290_v21 = vadd.f32 %v2999_v0, %v289_v19 }
  0xc9   :  { %v3010_v22 = vadd.f32 %v338_v20, %v290_v21 }
  0xce   :  { %v292_v23 = vpop.f32.mrf.mxu0 }
  0xcf   :  { %v341_v24 = vpop.f32.mrf.mxu1  ;;  %v293_v25 = vadd.f32 %v2999_v0, %v292_v23 }
  0xd1   :  { %v3013_v26 = vadd.f32 %v341_v24, %v293_v25 }
  0xd6   :  { %v294_v27 = vpop.f32.mrf.mxu0 }
  0xd7   :  { %v343_v28 = vpop.f32.mrf.mxu1  ;;  %v295_v29 = vadd.f32 %v2999_v0, %v294_v27 }
  0xd9   :  { %v3016_v30 = vadd.f32 %v343_v28, %v295_v29 }
  0xde   :  { %v297_v31 = vpop.f32.mrf.mxu0 }
  0xdf   :  { %v346_v32 = vpop.f32.mrf.mxu1  ;;  %v298_v33 = vadd.f32 %v2999_v0, %v297_v31  ;;  %v369_v31 = vmax.f32 %v3004_v14, 0.0 }
  0xe1   :  { %v347_v34 = vadd.f32 %v346_v32, %v298_v33  ;;  %v3097_v33 = vrot.slane %v3021_v36, 2 }
  0xe3   :  { %v3019_v35 = vmax.f32 %v347_v34, 0.0 }
  0xe5   :  { %v384_v39 = vrot.slane %v3019_v35, 7  ;;  %v489_v61 = vsel %vm486_vm0, %v3019_v35, %v3057_v58  ;;  %v3074_v19 = vrot.slane %v3019_v35, 2  ;;  %v3078_v20 = vrot.slane %v3019_v35, 1 }
  0xe6   :  { %v299_v37 = vpop.f32.mrf.mxu0 }
  0xe7   :  { %v348_v38 = vpop.f32.mrf.mxu1  ;;  %v300_v41 = vadd.f32 %v2999_v0, %v299_v37  ;;  %v3028_v42 = vsel %vm486_vm0, %v384_v39, %v3021_v36  ;;  %v3032_v44 = vsel %vm385_vm2, %v384_v39, %v3021_v36  ;;  %v3036_v45 = vsel %vm555_vm1, %v384_v39, %v3021_v36 }
  0xe8   :  { %v497_v32 = vsel %vm486_vm0, %v3074_v19, %v3071_v17  ;;  %v493_v14 = vsel %vm486_vm0, %v3078_v20, %v3097_v33 }
  0xe9   :  { %v349_v43 = vadd.f32 %v348_v38, %v300_v41 }
  0xeb   :  { %v3038_v47 = vmax.f32 %v349_v43, 0.0 }
  0xed   :  { %v407_v51 = vrot.slane %v3038_v47, 7 }
  0xee   :  { %v302_v49 = vpop.f32.mrf.mxu0 }
  0xef   :  { %v351_v50 = vpop.f32.mrf.mxu1  ;;  %v303_v53 = vadd.f32 %v2999_v0, %v302_v49  ;;  %v3046_v54 = vsel %vm486_vm0, %v407_v51, %v3040_v48  ;;  %v3050_v56 = vsel %vm385_vm2, %v407_v51, %v3040_v48  ;;  %v3054_v57 = vsel %vm555_vm1, %v407_v51, %v3040_v48 }
  0xf0   :  { %4003 = vst [vmem:[#allocation5_spill] sm:$0xff] %v3046_v54  ;;  %v459_v49 = vrot.slane %v369_v31, 2  ;;  %v3107_v51 = vrot.slane %v3040_v48, 2 }
  0xf1   :  { %v352_v55 = vadd.f32 %v351_v50, %v303_v53  ;;  %4004 = vst [vmem:[#allocation6_spill] sm:$0xff] %v3050_v56 }
  0xf2   :  { %4005 = vst [vmem:[#allocation7_spill] sm:$0xff] %v3054_v57 }
  0xf3   :  { %v376_v59 = vmax.f32 %v352_v55, 0.0  ;;  %v454_v55 = vrot.slane %v369_v31, 1 }
  0xf5   :  { %v517_v63 = vsel %vm486_vm0, %v376_v59, %v432_v60  ;;  %v586_v1 = vsel %vm555_vm1, %v376_v59, %v432_v60  ;;  %v433_v2 = vsel %vm385_vm2, %v376_v59, %v432_v60  ;;  %v444_v3 = vrot.slane %v376_v59, 2 }
  0xf6   :  { %v304_v4 = vpop.f32.mrf.mxu0  ;;  %v2578_v6 = vpack.i.bf16 %v586_v1, %v517_v63  ;;  %v2583_v7 = vpack.i.bf16 %v489_v61, %v433_v2  ;;  %v429_v8 = vrot.slane %v376_v59, 7  ;;  %v438_v12 = vrot.slane %v376_v59, 1 }
  0xf7   :  { %v353_v5 = vpop.f32.mrf.mxu1  ;;  %v305_v9 = vadd.f32 %v2999_v0, %v304_v4  ;;  %v525_v10 = vsel %vm486_vm0, %v444_v3, %v443_v62  ;;  %v594_v11 = vsel %vm555_vm1, %v444_v3, %v443_v62  ;;  %v445_v29 = vsel %vm385_vm2, %v444_v3, %v443_v62 }
  0xf8   :  { %2579 = vrot.lane.b32.xlu0 %v2578_v6, %s2788_s0  ;;  %2584 = vrot.lane.b32.xlu1 %v2583_v7, %s2788_s0  ;;  %v2593_v13 = vpack.i.bf16 %v594_v11, %v525_v10  ;;  %v3081_v21 = vsel %vm486_vm0, %v429_v8, %v368_v52  ;;  %v3084_v23 = vsel %vm555_vm1, %v429_v8, %v368_v52  ;;  %v370_v2 = vmax.f32 %v3007_v18, 0.0 }
  0xf9   :  { %v354_v15 = vadd.f32 %v353_v5, %v305_v9  ;;  %v3087_v24 = vsel %vm385_vm2, %v429_v8, %v368_v52  ;;  %v521_v27 = vsel %vm486_vm0, %v438_v12, %v437_v16  ;;  %v590_v28 = vsel %vm555_vm1, %v438_v12, %v437_v16 }
  0xfa   :  { %2594 = vrot.lane.b32.xlu2 %v2593_v13, %s2789_s2  ;;  %v439_v34 = vsel %vm385_vm2, %v438_v12, %v437_v16  ;;  %v2588_v39 = vpack.i.bf16 %v590_v28, %v521_v27  ;;  %v2603_v40 = vpack.i.bf16 %v497_v32, %v445_v29  ;;  %v3110_v52 = vrot.slane %v3038_v47, 1 }
  0xfb   :  { %v377_v25 = vmax.f32 %v354_v15, 0.0  ;;  %v2598_v36 = vpack.i.bf16 %v493_v14, %v439_v34  ;;  %v3139_v15 = vrot.slane %v369_v31, 3  ;;  %v3141_v16 = vrot.slane %v370_v2, 1 }
  0xfc   :  { %v507_v3 = vsel %vm486_vm0, %v3110_v52, %v3107_v51 }
  0xfd   :  { %v460_v41 = vrot.slane %v377_v25, 1  ;;  %v451_v43 = vrot.slane %v377_v25, 7  ;;  %v531_v4 = vsel %vm486_vm0, %v377_v25, %v454_v55  ;;  %v600_v5 = vsel %vm555_vm1, %v377_v25, %v454_v55 }
  0xfe   :  { %v307_v37 = vpop.f32.mrf.mxu0  ;;  %v3135_v12 = vrot.slane %v377_v25, 2  ;;  %v2608_v18 = vpack.i.bf16 %v600_v5, %v531_v4  ;;  %v3192_v4 = vrot.slane %v370_v2, 3 }
  0xff   :  { %v356_v38 = vpop.f32.mrf.mxu1  ;;  %v308_v46 = vadd.f32 %v2999_v0, %v307_v37  ;;  %v535_v53 = vsel %vm486_vm0, %v460_v41, %v459_v49  ;;  %v3115_v59 = vsel %vm486_vm0, %v451_v43, %v369_v31  ;;  %v3118_v60 = vsel %vm555_vm1, %v451_v43, %v369_v31 }
 0x100   :  { %2589 = vrot.lane.b32.xlu0 %v2588_v39, %s2790_s17  ;;  %2604 = vrot.lane.b32.xlu1 %v2603_v40, %s2789_s2  ;;  %v604_v62 = vsel %vm555_vm1, %v460_v41, %v459_v49  ;;  %v461_v63 = vsel %vm385_vm2, %v460_v41, %v459_v49  ;;  %v3125_v1 = vsel %vm385_vm2, %v451_v43, %v369_v31  ;;  %v3171_v40 = vrot.slane %v3040_v48, 1 }
 0x101   :  { %v357_v50 = vadd.f32 %v356_v38, %v308_v46  ;;  %4006 = vst [vmem:[#allocation8_spill] sm:$0xff] %v3125_v1  ;;  %v2618_v8 = vpack.i.bf16 %v604_v62, %v535_v53  ;;  %v2628_v9 = vpack.i.bf16 %v507_v3, %v461_v63  ;;  %v539_v31 = vsel %vm486_vm0, %v3135_v12, %v3139_v15 }
 0x102   :  { %2599 = vrot.lane.b32.xlu2 %v2598_v36, %s2790_s17  ;;  %v608_v34 = vsel %vm555_vm1, %v3135_v12, %v3139_v15  ;;  %v3165_v38 = vmax.f32 %v3013_v26, 0.0  ;;  %v389_v39 = vsel %vm385_vm2, %v3019_v35, %v3057_v58  ;;  %v455_v41 = vsel %vm385_vm2, %v377_v25, %v454_v55 }
 0x103   :  { %v3120_v61 = vmax.f32 %v357_v50, 0.0  ;;  %v2623_v14 = vpack.i.bf16 %v608_v34, %v539_v31  ;;  %v503_v26 = vsel %vm486_vm0, %v3038_v47, %v3171_v40  ;;  %v3183_v62 = vmax.f32 %v3010_v22, 0.0 }
 0x104   :  { %v2613_v25 = vpack.i.bf16 %v503_v26, %v455_v41  ;;  %v3187_v55 = vrot.slane %v370_v2, 2  ;;  %v3195_v5 = vrot.slane %v3165_v38, 1  ;;  %v3201_v22 = vmax.f32 %v3016_v30, 0.0 }
 0x105   :  { %v626_v10 = vrot.slane %v3120_v61, 7  ;;  %v630_v37 = vsel %vm385_vm2, %v3120_v61, %v3141_v16  ;;  %v3180_v53 = vrot.slane %v3120_v61, 1  ;;  %v3190_v63 = vrot.slane %v3120_v61, 2 }
 0x106   :  { %v309_v6 = vpop.f32.mrf.mxu0  ;;  %v2633_v36 = vpack.i.bf16 %v389_v39, %v630_v37  ;;  %v566_v31 = vsel %vm555_vm1, %v3074_v19, %v3071_v17  ;;  %v656_v57 = vrot.slane %v3183_v62, 2 }
 0x107   :  { %v358_v7 = vpop.f32.mrf.mxu1  ;;  %v310_v11 = vadd.f32 %v2999_v0, %v309_v6  ;;  %v3145_v27 = vsel %vm385_vm2, %v626_v10, %v370_v2  ;;  %v3148_v28 = vsel %vm486_vm0, %v626_v10, %v370_v2  ;;  %v3151_v29 = vsel %vm555_vm1, %v626_v10, %v370_v2 }
 0x108   :  { %2619 = vrot.lane.b32.xlu0 %v2618_v8, %s2790_s17  ;;  %2629 = vrot.lane.b32.xlu1 %v2628_v9, %s2790_s17  ;;  %4007 = vst [vmem:[#allocation9_spill] sm:$0xff] %v3151_v29  ;;  %v3198_v6 = vrot.slane %v3165_v38, 2  ;;  %v3208_v8 = vrot.slane %v3165_v38, 3  ;;  %v636_v30 = vsel %vm385_vm2, %v3180_v53, %v3187_v55  ;;  %v684_v34 = vsel %vm486_vm0, %v3190_v63, %v3192_v4 }
 0x109   :  { %v359_v13 = vadd.f32 %v358_v7, %v310_v11  ;;  %v676_v7 = vsel %vm486_vm0, %v3120_v61, %v3141_v16 }
 0x10a   :  { %2609 = vrot.lane.b32.xlu2 %v2608_v18, %s2788_s0  ;;  %v395_v18 = vsel %vm385_vm2, %v3078_v20, %v3097_v33 }
 0x10b   :  { %v3153_v32 = vmax.f32 %v359_v13, 0.0  ;;  %v558_v13 = vsel %vm555_vm1, %v3019_v35, %v3057_v58 }
 0x10d   :  { %v648_v49 = vrot.slane %v3153_v32, 7  ;;  %v663_v56 = vrot.slane %v3153_v32, 2 }
 0x10e   :  { %v312_v43 = vpop.f32.mrf.mxu0 }
 0x10f   :  { %v361_v46 = vpop.f32.mrf.mxu1  ;;  %v313_v50 = vadd.f32 %v2999_v0, %v312_v43  ;;  %v3212_v2 = vsel %vm385_vm2, %v648_v49, %v3183_v62  ;;  %v3221_v10 = vsel %vm486_vm0, %v648_v49, %v3183_v62  ;;  %v3225_v11 = vsel %vm555_vm1, %v648_v49, %v3183_v62 }
 0x110   :  { %2624 = vrot.lane.b32.xlu0 %v2623_v14, %s2789_s2  ;;  %2634 = vrot.lane.b32.xlu1 %v2633_v36, %s2788_s0  ;;  %4008 = vst [vmem:[#allocation10_spill] sm:$0xff] %v3221_v10  ;;  %v2638_v14 = vpack.i.bf16 %v558_v13, %v676_v7  ;;  %v3277_v7 = vrot.slane %v3183_v62, 1  ;;  %v3319_v36 = vrot.slane %v3201_v22, 3 }
 0x111   :  { %v362_v3 = vadd.f32 %v361_v46, %v313_v50  ;;  %4009 = vst [vmem:[#allocation11_spill] sm:$0xff] %v3225_v11  ;;  %v2643_v46 = vpack.i.bf16 %v395_v18, %v636_v30  ;;  %v642_v30 = vsel %vm385_vm2, %v3190_v63, %v3192_v4 }
 0x112   :  { %2614 = vrot.lane.b32.xlu2 %v2613_v25, %s2788_s0 }
 0x113   :  { %v3214_v9 = vmax.f32 %v362_v3, 0.0 }
 0x115   :  { %v3242_v37 = vsel %vm385_vm2, %v3214_v9, %v3195_v5  ;;  %v3247_v39 = vsel %vm486_vm0, %v3214_v9, %v3195_v5  ;;  %v3250_v35 = vrot.slane %v3214_v9, 1  ;;  %v3253_v58 = vrot.slane %v3214_v9, 2 }
 0x116   :  { %v314_v41 = vpop.f32.mrf.mxu0  ;;  %v744_v49 = vrot.slane %v3214_v9, 7 }
 0x117   :  { %v363_v43 = vpop.f32.mrf.mxu1  ;;  %v315_v50 = vadd.f32 %v2999_v0, %v314_v41  ;;  %v3262_v26 = vsel %vm385_vm2, %v3250_v35, %v3198_v6  ;;  %v3267_v25 = vsel %vm486_vm0, %v3250_v35, %v3198_v6  ;;  %v3272_v3 = vsel %vm385_vm2, %v3253_v58, %v3208_v8 }
 0x118   :  { %2644 = vrot.lane.b32.xlu0 %v2643_v46, %s2790_s17  ;;  %2639 = vrot.lane.b32.xlu1 %v2638_v14, %s2788_s0  ;;  %v2658_v0 = vpack.i.bf16 %v566_v31, %v684_v34  ;;  %v3284_v18 = vsel %vm486_vm0, %v3253_v58, %v3208_v8  ;;  %v680_v41 = vsel %vm486_vm0, %v3180_v53, %v3187_v55  ;;  %v3297_v34 = vrot.slane %v3201_v22, 1 }
 0x119   :  { %v364_v13 = vadd.f32 %v363_v43, %v315_v50  ;;  %v3293_v31 = vsel %vm385_vm2, %v744_v49, %v3165_v38  ;;  %v3300_v14 = vrot.slane %v3201_v22, 2  ;;  %v3304_v43 = vsel %vm486_vm0, %v744_v49, %v3165_v38 }
 0x11a   :  { %4010 = vst [vmem:[#allocation12_spill] sm:$0xff] %v3293_v31  ;;  %2659 = vrot.lane.b32.xlu2 %v2658_v0, %s2789_s2  ;;  %v3308_v50 = vsel %vm555_vm1, %v744_v49, %v3165_v38  ;;  %v562_v0 = vsel %vm555_vm1, %v3078_v20, %v3097_v33  ;;  %v411_v38 = vsel %vm385_vm2, %v3038_v47, %v3171_v40 }
 0x11b   :  { %4011 = vst [vmem:[#allocation13_spill] sm:$0xff] %v3304_v43  ;;  %v3310_v46 = vmax.f32 %v364_v13, 0.0  ;;  %v2653_v31 = vpack.i.bf16 %v562_v0, %v680_v41  ;;  %v401_v43 = vsel %vm385_vm2, %v3074_v19, %v3071_v17  ;;  %v652_v20 = vsel %vm385_vm2, %v3153_v32, %v3277_v7 }
 0x11c   :  { %4012 = vst [vmem:[#allocation14_spill] sm:$0xff] %v3308_v50  ;;  %v2648_v13 = vpack.i.bf16 %v401_v43, %v642_v30  ;;  %v657_v41 = vrot.slane %v3153_v32, 1  ;;  %v2663_v43 = vpack.i.bf16 %v411_v38, %v652_v20  ;;  %v662_v38 = vrot.slane %v3183_v62, 3 }
 0x11d   :  { %v3333_v33 = vsel %vm385_vm2, %v3310_v46, %v3297_v34  ;;  %v3338_v49 = vsel %vm486_vm0, %v3310_v46, %v3297_v34  ;;  %v3341_v17 = vrot.slane %v3310_v46, 1  ;;  %v3344_v19 = vrot.slane %v3310_v46, 2 }
 0x11e   :  { %v2728_v0 = vpack.i.bf16 %v3338_v49, %v3333_v33  ;;  %v766_v50 = vrot.slane %v3310_v46, 7  ;;  %v572_v20 = vsel %vm555_vm1, %v3038_v47, %v3171_v40  ;;  %v467_v40 = vsel %vm385_vm2, %v3135_v12, %v3139_v15 }
 0x11f   :  { %v776_v29 = vsel %vm385_vm2, %v3341_v17, %v3300_v14  ;;  %v812_v11 = vsel %vm486_vm0, %v3341_v17, %v3300_v14  ;;  %v782_v10 = vsel %vm385_vm2, %v3344_v19, %v3319_v36  ;;  %v816_v30 = vsel %vm486_vm0, %v3344_v19, %v3319_v36 }
 0x120   :  { %2654 = vrot.lane.b32.xlu0 %v2653_v31, %s2790_s17  ;;  %2649 = vrot.lane.b32.xlu1 %v2648_v13, %s2789_s2  ;;  %v2733_v33 = vpack.i.bf16 %v812_v11, %v776_v29  ;;  %v2738_v49 = vpack.i.bf16 %v816_v30, %v782_v10  ;;  %v3368_v1 = vsel %vm385_vm2, %v766_v50, %v3201_v22  ;;  %v422_v11 = vrot.slane %v3038_v47, 2 }
 0x121   :  { %v3372_v54 = vsel %vm486_vm0, %v766_v50, %v3201_v22  ;;  %v3377_v31 = vsel %vm555_vm1, %v766_v50, %v3201_v22  ;;  %v690_v29 = vsel %vm486_vm0, %v3153_v32, %v3277_v7  ;;  %v658_v10 = vsel %vm385_vm2, %v657_v41, %v656_v57 }
 0x122   :  { %2664 = vrot.lane.b32.xlu2 %v2663_v43, %s2788_s0  ;;  %4013 = vst [vmem:[#allocation15_spill] sm:$0xff] %v3377_v31  ;;  %v417_v13 = vsel %vm385_vm2, %v3110_v52, %v3107_v51  ;;  %v421_v22 = vrot.slane %v3040_v48, 3  ;;  %v664_v50 = vsel %vm385_vm2, %v663_v56, %v662_v38  ;;  %v2668_v30 = vpack.i.bf16 %v572_v20, %v690_v29 }
 0x123   :  { %v2673_v43 = vpack.i.bf16 %v417_v13, %v658_v10  ;;  %v694_v47 = vsel %vm486_vm0, %v657_v41, %v656_v57  ;;  %v576_v48 = vsel %vm555_vm1, %v3110_v52, %v3107_v51  ;;  %v698_v10 = vsel %vm486_vm0, %v663_v56, %v662_v38 }
 0x124   :  { %v423_v31 = vsel %vm385_vm2, %v422_v11, %v421_v22  ;;  %v511_v29 = vsel %vm486_vm0, %v422_v11, %v421_v22  ;;  %v2683_v20 = vpack.i.bf16 %v576_v48, %v694_v47  ;;  %v724_v12 = vsel %vm555_vm1, %v3153_v32, %v3277_v7 }
 0x125   :  { %v2678_v62 = vpack.i.bf16 %v423_v31, %v664_v50  ;;  %v2688_v13 = vpack.i.bf16 %v511_v29, %v467_v40  ;;  %v580_v31 = vsel %vm555_vm1, %v422_v11, %v421_v22  ;;  %v728_v51 = vsel %vm555_vm1, %v657_v41, %v656_v57 }
 0x126   :  { %v2693_v50 = vpack.i.bf16 %v580_v31, %v698_v10  ;;  %v710_v52 = vsel %vm555_vm1, %v3120_v61, %v3141_v16  ;;  %v714_v15 = vsel %vm555_vm1, %v3180_v53, %v3187_v55  ;;  %v732_v11 = vsel %vm555_vm1, %v663_v56, %v662_v38 }
 0x127   :  { %v2698_v22 = vpack.i.bf16 %v724_v12, %v710_v52  ;;  %v4014_v61 = vpack.i.bf16 %v3247_v39, %v3242_v37  ;;  %v4015_v56 = vpack.i.bf16 %v3267_v25, %v3262_v26  ;;  %v4016_v16 = vpack.i.bf16 %v3284_v18, %v3272_v3  ;;  %v2495_v52 = vld [vmem:[%s3994_s3 + $0x68] sm:$0xff] }
 0x128   :  { %2669 = vrot.lane.b32.xlu0 %v2668_v30, %s2788_s0  ;;  %2674 = vrot.lane.b32.xlu1 %v2673_v43, %s2790_s17  ;;  %v2703_v30 = vpack.i.bf16 %v728_v51, %v714_v15  ;;  %v718_v43 = vsel %vm555_vm1, %v3190_v63, %v3192_v4  ;;  %v842_v32 = vsel %vm555_vm1, %v3310_v46, %v3297_v34  ;;  %v2485_v46 = vld [vmem:[%s3994_s3 + $0x18] sm:$0xff] }
 0x129   :  { %v2708_v57 = vpack.i.bf16 %v732_v11, %v718_v43  ;;  %v846_v53 = vsel %vm555_vm1, %v3341_v17, %v3300_v14  ;;  %v828_v55 = vsel %vm555_vm1, %v3214_v9, %v3195_v5  ;;  %v832_v63 = vsel %vm555_vm1, %v3250_v35, %v3198_v6  ;;  %v2489_v6 = vld [vmem:[%s3994_s3 + $0x38] sm:$0xff]  ;;  %v2488_v35 = vld [vmem:[%s3994_s3 + $0x30] sm:$0xff] }
 0x12a   :  { %2679 = vrot.lane.b32.xlu2 %v2678_v62, %s2789_s2  ;;  %v850_v4 = vsel %vm555_vm1, %v3344_v19, %v3319_v36  ;;  %v2743_v37 = vpack.i.bf16 %v842_v32, %v828_v55  ;;  %v2748_v39 = vpack.i.bf16 %v846_v53, %v832_v63  ;;  %v836_v26 = vsel %vm555_vm1, %v3253_v58, %v3208_v8  ;;  %v2487_v8 = vld [vmem:[%s3994_s3 + $0x28] sm:$0xff]  ;;  %v2486_v36 = vld [vmem:[%s3994_s3 + $0x20] sm:$0xff]  ;;  %v2497_v34 = vld [vmem:[%s3994_s3 + $0x78] sm:$0xff] }
 0x12b   :  { %v2753_v25 = vpack.i.bf16 %v850_v4, %v836_v26  ;;  %1221 = vmatpush.bf16.msra.mxu2 %v2489_v6  ;;  %1239 = vmatpush.bf16.msra.mxu3 %v2497_v34  ;;  %v2496_v19 = vld [vmem:[%s3994_s3 + $0x70] sm:$0xff]  ;;  %v2493_v53 = vld [vmem:[%s3994_s3 + $0x58] sm:$0xff] }
 0x12c   :  { %v2505_v34 = vld [vmem:[%s3994_s3 + $0xb8] sm:$0xff] }
 0x12f   :  { %1222 = vmatpush.bf16.msra.mxu2 %v2488_v35  ;;  %1240 = vmatpush.bf16.msra.mxu3 %v2496_v19  ;;  %v2504_v19 = vld [vmem:[%s3994_s3 + $0xb0] sm:$0xff] }
 0x130   :  { %2684 = vrot.lane.b32.xlu0 %v2683_v20, %s2790_s17  ;;  %2689 = vrot.lane.b32.xlu1 %v2688_v13, %s2789_s2 }
 0x132   :  { %2694 = vrot.lane.b32.xlu2 %v2693_v50, %s2789_s2 }
 0x133   :  { %1223 = vmatpush.bf16.msra.mxu2 %v2487_v8  ;;  %1241 = vmatpush.bf16.msra.mxu3 %v2495_v52 }
 0x137   :  { %1224 = vmatpush.bf16.msra.mxu2 %v2486_v36 }
 0x138   :  { %2699 = vrot.lane.b32.xlu0 %v2698_v22, %s2788_s0  ;;  %2704 = vrot.lane.b32.xlu1 %v2703_v30, %s2790_s17  ;;  %v2494_v30 = vld [vmem:[%s3994_s3 + $0x60] sm:$0xff] }
 0x139   :  { %1242 = vmatpush.bf16.msra.mxu3 %v2494_v30 }
 0x13a   :  { %2709 = vrot.lane.b32.xlu2 %v2708_v57, %s2789_s2  ;;  %v2482_v57 = vld [vmem:[%s3994_s3] sm:$0xff] }
 0x13b   :  { %1225 = vmatpush.bf16.msra.mxu2 %v2485_v46 }
 0x13d   :  { %1243 = vmatpush.bf16.msra.mxu3 %v2493_v53 }
 0x140   :  { %2714 = vrot.lane.b32.xlu0 %v4014_v61, %s2788_s0  ;;  %2719 = vrot.lane.b32.xlu1 %v4015_v56, %s2790_s17 }
 0x142   :  { %2724 = vrot.lane.b32.xlu2 %v4016_v16, %s2789_s2 }
 0x148   :  { %2729 = vrot.lane.b32.xlu0 %v2728_v0, %s2788_s0  ;;  %2734 = vrot.lane.b32.xlu1 %v2733_v33, %s2790_s17  ;;  %v2484_v0 = vld [vmem:[%s3994_s3 + $0x10] sm:$0xff] }
 0x149   :  { %1226 = vmatpush.bf16.msra.mxu2 %v2484_v0 }
 0x14a   :  { %2739 = vrot.lane.b32.xlu2 %v2738_v49, %s2789_s2 }
 0x150   :  { %2744 = vrot.lane.b32.xlu0 %v2743_v37, %s2788_s0  ;;  %2749 = vrot.lane.b32.xlu1 %v2748_v39, %s2790_s17  ;;  %v2492_v39 = vld [vmem:[%s3994_s3 + $0x50] sm:$0xff]  ;;  %s1942_s0 = sshll.u32 %s4002_s11, 4  ;;  %s1943_s0 = int_to_ptr.hbm [resolvable:$true] %s1942_s0 }
 0x151   :  { %1244 = vmatpush.bf16.msra.mxu3 %v2492_v39 }
 0x152   :  { %2754 = vrot.lane.b32.xlu2 %v2753_v25, %s2789_s2 }
 0x154   :  { %v2595_v5 = vpop.permute.xlu2 %2594 }
 0x155   :  { %v2597_v33 = vunpack.i.h.bf16 %v2595_v5  ;;  %v2596_v47 = vunpack.i.l.bf16 %v2595_v5 }
 0x15c   :  { %v3463_v9 = vpop.permute.xlu2 %2599 }
 0x15d   :  { %v2601_v49 = vunpack.i.l.bf16 %v3463_v9 }
 0x164   :  { %v3474_v58 = vpop.permute.xlu2 %2609 }
 0x165   :  { %v2612_v55 = vunpack.i.h.bf16 %v3474_v58  ;;  %v2611_v63 = vunpack.i.l.bf16 %v3474_v58 }
 0x167   :  { %v621_v5 = vsel %vm471_vm3, %v3118_v60, %v2612_v55  ;;  %v552_v6 = vsel %vm471_vm3, %v3115_v59, %v2611_v63  ;;  %v2491_v59 = vld [vmem:[%s3994_s3 + $0x48] sm:$0xff] }
 0x168   :  { %1245 = vmatpush.bf16.msra.mxu3 %v2491_v59 }
 0x16a   :  { %v2580_v3 = vpop.permute.xlu0 %2579  ;;  %v3479_v7 = vpop.permute.xlu1 %2584 }
 0x16b   :  { %v2586_v18 = vunpack.i.l.bf16 %v3479_v7  ;;  %v2582_v14 = vunpack.i.h.bf16 %v2580_v3  ;;  %v2581_v17 = vunpack.i.l.bf16 %v2580_v3  ;;  %v2587_v0 = vunpack.i.h.bf16 %v3479_v7  ;;  %v2512_v7 = vld [vmem:[%s3994_s3 + $0xf0] sm:$0xff] }
 0x16c   :  { %v3499_v40 = vpop.permute.xlu2 %2614 }
 0x16d   :  { %v480_v41 = vsel %vm471_vm3, %v3087_v24, %v2586_v18  ;;  %v618_v10 = vsel %vm471_vm3, %v3084_v23, %v2582_v14  ;;  %v549_v20 = vsel %vm471_vm3, %v3081_v21, %v2581_v17  ;;  %v2483_v21 = vld [vmem:[%s3994_s3 + $0x8] sm:$0xff]  ;;  %v2490_v17 = vld [vmem:[%s3994_s3 + $0x40] sm:$0xff] }
 0x16e   :  { %v481_v13 = vsel %vm473_vm4, %v480_v41, %v2601_v49  ;;  %1227 = vmatpush.bf16.msra.mxu2 %v2483_v21  ;;  %1246 = vmatpush.bf16.msra.mxu3 %v2490_v17 }
 0x172   :  { %v2590_v38 = vpop.permute.xlu0 %2589  ;;  %v3497_v62 = vpop.permute.xlu1 %2604  ;;  %1228 = vmatpush.bf16.msra.mxu2 %v2482_v57 }
 0x173   :  { %v2592_v48 = vunpack.i.h.bf16 %v2590_v38  ;;  %v2591_v29 = vunpack.i.l.bf16 %v2590_v38  ;;  %v2606_v24 = vunpack.i.l.bf16 %v3497_v62  ;;  %v2513_v38 = vld [vmem:[%s3994_s3 + $0xf8] sm:$0xff] }
 0x174   :  { %v3536_v32 = vpop.permute.xlu2 %2659  ;;  %1275 = vmatpush.bf16.msrb.mxu3 %v2513_v38 }
 0x175   :  { %v550_v31 = vsel %vm473_vm4, %v549_v20, %v2591_v29  ;;  %v619_v50 = vsel %vm473_vm4, %v618_v10, %v2592_v48  ;;  %v3510_v12 = vsel %vm475_vm5, %v481_v13, %v2606_v24  ;;  %v2503_v24 = vld [vmem:[%s3994_s3 + $0xa8] sm:$0xff]  ;;  %v2602_v10 = vunpack.i.h.bf16 %v3463_v9 }
 0x176   :  { %v551_v51 = vsel %vm475_vm5, %v550_v31, %v2596_v47  ;;  %v620_v23 = vsel %vm475_vm5, %v619_v50, %v2597_v33  ;;  %1257 = vmatpush.bf16.msrb.mxu2 %v2505_v34  ;;  %v543_v47 = vsel %vm471_vm3, %v3028_v42, %v2587_v0  ;;  %v2502_v42 = vld [vmem:[%s3994_s3 + $0xa0] sm:$0xff]  ;;  %v2662_v9 = vunpack.i.h.bf16 %v3536_v32 }
 0x177   :  { %v876_v15 = vrot.slane %v551_v51, 2  ;;  %v888_v11 = vrot.slane %v620_v23, 2  ;;  %v929_v22 = vsel %vm926_vm6, %v3510_v12, %v551_v51  ;;  %v2607_v51 = vunpack.i.h.bf16 %v3497_v62  ;;  %v2510_v34 = vld [vmem:[%s3994_s3 + $0xe0] sm:$0xff] }
 0x178   :  { %v3526_v43 = vsel %vm931_vm7, %v929_v22, %v620_v23  ;;  %v544_v23 = vsel %vm473_vm4, %v543_v47, %v2602_v10  ;;  %v2661_v52 = vunpack.i.l.bf16 %v3536_v32  ;;  %1276 = vmatpush.bf16.msrb.mxu3 %v2512_v7 }
 0x179   :  { %v3532_v61 = vsel %vm926_vm6, %v876_v15, %v888_v11 }
 0x17a   :  { %v2620_v56 = vpop.permute.xlu0 %2619  ;;  %v3534_v16 = vpop.permute.xlu1 %2629  ;;  %1258 = vmatpush.bf16.msrb.mxu2 %v2504_v19 }
 0x17b   :  { %v2622_v4 = vunpack.i.h.bf16 %v2620_v56  ;;  %v2621_v37 = vunpack.i.l.bf16 %v2620_v56 }
 0x17c   :  { %v3566_v14 = vpop.permute.xlu2 %2664 }
 0x17d   :  { %v553_v36 = vsel %vm473_vm4, %v552_v6, %v2621_v37  ;;  %v622_v58 = vsel %vm473_vm4, %v621_v5, %v2622_v4  ;;  %v2667_v10 = vunpack.i.h.bf16 %v3566_v14 }
 0x17e   :  { %1259 = vmatpush.bf16.msrb.mxu2 %v2503_v24  ;;  %v2617_v24 = vunpack.i.h.bf16 %v3499_v40 }
 0x182   :  { %v2625_v26 = vpop.permute.xlu0 %2624  ;;  %v2635_v25 = vpop.permute.xlu1 %2634  ;;  %1260 = vmatpush.bf16.msrb.mxu2 %v2502_v42  ;;  %v2509_v42 = vld [vmem:[%s3994_s3 + $0xd8] sm:$0xff] }
 0x183   :  { %v2627_v35 = vunpack.i.h.bf16 %v2625_v26  ;;  %v2626_v8 = vunpack.i.l.bf16 %v2625_v26  ;;  %v2637_v48 = vunpack.i.h.bf16 %v2635_v25  ;;  %v2636_v29 = vunpack.i.l.bf16 %v2635_v25 }
 0x184   :  { %v3595_v21 = vpop.permute.xlu2 %2679  ;;  %v545_v26 = vsel %vm475_vm5, %v544_v23, %v2607_v51  ;;  %v4017_v23 = vld [vmem:[#allocation5_spill] sm:$0xff] }
 0x185   :  { %v3553_v3 = vsel %vm475_vm5, %v553_v36, %v2626_v8  ;;  %v3556_v18 = vsel %vm475_vm5, %v622_v58, %v2627_v35  ;;  %v472_v15 = vsel %vm471_vm3, %v3032_v44, %v2637_v48  ;;  %v668_v11 = vsel %vm471_vm3, %v3145_v27, %v2636_v29  ;;  %v2511_v8 = vld [vmem:[%s3994_s3 + $0xe8] sm:$0xff]  ;;  %v2501_v36 = vld [vmem:[%s3994_s3 + $0x98] sm:$0xff] }
 0x186   :  { %v877_v46 = vrot.slane %v3553_v3, 2  ;;  %v889_v60 = vrot.slane %v3556_v18, 2  ;;  %v2666_v58 = vunpack.i.l.bf16 %v3566_v14  ;;  %1277 = vmatpush.bf16.msrb.mxu3 %v2511_v8  ;;  %1261 = vmatpush.bf16.msrb.mxu2 %v2501_v36  ;;  %v2681_v48 = vunpack.i.l.bf16 %v3595_v21 }
 0x188   :  { %v3575_v41 = vsel %vm926_vm6, %v877_v46, %v889_v60  ;;  %v671_v47 = vsel %vm471_vm3, %v3212_v2, %v2666_v58  ;;  %v2507_v58 = vld [vmem:[%s3994_s3 + $0xc8] sm:$0xff] }
 0x18a   :  { %v2645_v33 = vpop.permute.xlu0 %2644  ;;  %v2640_v49 = vpop.permute.xlu1 %2639  ;;  %1278 = vmatpush.bf16.msrb.mxu3 %v2510_v34 }
 0x18b   :  { %v2647_v20 = vunpack.i.h.bf16 %v2645_v33  ;;  %v2646_v13 = vunpack.i.l.bf16 %v2645_v33  ;;  %v2642_v31 = vunpack.i.h.bf16 %v2640_v49  ;;  %v2641_v50 = vunpack.i.l.bf16 %v2640_v49 }
 0x18c   :  { %v2695_v49 = vpop.permute.xlu2 %2694 }
 0x18d   :  { %v474_v55 = vsel %vm473_vm4, %v472_v15, %v2647_v20  ;;  %v669_v63 = vsel %vm473_vm4, %v668_v11, %v2646_v13  ;;  %v612_v32 = vsel %vm471_vm3, %v3036_v45, %v2642_v31  ;;  %v702_v44 = vsel %vm471_vm3, %v3148_v28, %v2641_v50  ;;  %v4019_v15 = vld [vmem:[#allocation6_spill] sm:$0xff] }
 0x18e   :  { %v864_v28 = vrot.slane %v3510_v12, 2  ;;  %v2632_v20 = vunpack.i.h.bf16 %v3534_v16  ;;  %v2631_v13 = vunpack.i.l.bf16 %v3534_v16  ;;  %v4018_v16 = vld [vmem:[#allocation8_spill] sm:$0xff]  ;;  %v477_v11 = vsel %vm471_vm3, %v4019_v15, %v2667_v10  ;;  %1279 = vmatpush.bf16.msrb.mxu3 %v2509_v42  ;;  %v4023_v42 = vld [vmem:[#allocation9_spill] sm:$0xff] }
 0x192   :  { %v2655_v22 = vpop.permute.xlu0 %2654  ;;  %v2650_v30 = vpop.permute.xlu1 %2649 }
 0x193   :  { %v2657_v57 = vunpack.i.h.bf16 %v2655_v22  ;;  %v2656_v56 = vunpack.i.l.bf16 %v2655_v22  ;;  %v2652_v53 = vunpack.i.h.bf16 %v2650_v30  ;;  %v2651_v62 = vunpack.i.l.bf16 %v2650_v30  ;;  %v2508_v30 = vld [vmem:[%s3994_s3 + $0xd0] sm:$0xff] }
 0x194   :  { %1280 = vmatpush.bf16.msrb.mxu3 %v2508_v30 }
 0x195   :  { %v613_v27 = vsel %vm473_vm4, %v612_v32, %v2657_v57  ;;  %v703_v4 = vsel %vm473_vm4, %v702_v44, %v2656_v56  ;;  %v476_v37 = vsel %vm475_vm5, %v474_v55, %v2652_v53  ;;  %v670_v39 = vsel %vm475_vm5, %v669_v63, %v2651_v62 }
 0x196   :  { %v866_v25 = vrot.slane %v670_v39, 2  ;;  %v898_v5 = vrot.slane %v670_v39, 4  ;;  %v614_v6 = vsel %vm475_vm5, %v613_v27, %v2662_v9  ;;  %v3616_v45 = vsel %vm475_vm5, %v703_v4, %v2661_v52 }
 0x197   :  { %v927_v35 = vsel %vm926_vm6, %v476_v37, %v545_v26  ;;  %v908_v46 = vrot.slane %v3616_v45, 4  ;;  %v546_v9 = vsel %vm471_vm3, %v4017_v23, %v2617_v24  ;;  %v2682_v53 = vunpack.i.h.bf16 %v3595_v21  ;;  %v4020_v26 = vld [vmem:[#allocation7_spill] sm:$0xff] }
 0x198   :  { %v932_v60 = vsel %vm931_vm7, %v927_v35, %v614_v6  ;;  %v945_v59 = vsel %vm931_vm7, %v3532_v61, %v898_v5  ;;  %v3637_v17 = vsel %vm936_vm8, %v3526_v43, %v866_v25  ;;  %v2500_v61 = vld [vmem:[%s3994_s3 + $0x90] sm:$0xff]  ;;  %v2616_v43 = vunpack.i.l.bf16 %v3499_v40  ;;  %v2499_v40 = vld [vmem:[%s3994_s3 + $0x88] sm:$0xff]  ;;  %v2710_v6 = vpop.permute.xlu2 %2709  ;;  %1281 = vmatpush.bf16.msrb.mxu3 %v2507_v58 }
 0x199   :  { %v937_v12 = vsel %vm936_vm8, %v932_v60, %v864_v28  ;;  %v949_v33 = vsel %vm936_vm8, %v945_v59, %v908_v46  ;;  %1262 = vmatpush.bf16.msrb.mxu2 %v2500_v61  ;;  %v547_v57 = vsel %vm473_vm4, %v546_v9, %v2632_v20  ;;  %v2697_v37 = vunpack.i.h.bf16 %v2695_v49  ;;  %v4021_v5 = vld [vmem:[#allocation10_spill] sm:$0xff] }
 0x19a   :  { %v2670_v19 = vpop.permute.xlu0 %2669  ;;  %v2675_v0 = vpop.permute.xlu1 %2674  ;;  %v953_v29 = vpack.c.bf16 %v949_v33, %v937_v12  ;;  %v483_v52 = vsel %vm471_vm3, %v4018_v16, %v2616_v43  ;;  %v2696_v39 = vunpack.i.l.bf16 %v2695_v49  ;;  %v878_v9 = vrot.slane %v3616_v45, 2 }
 0x19b   :  { %v2676_v38 = vunpack.i.l.bf16 %v2675_v0  ;;  %v2677_v31 = vunpack.i.h.bf16 %v2675_v0  ;;  %v2672_v14 = vunpack.i.h.bf16 %v2670_v19  ;;  %v2671_v51 = vunpack.i.l.bf16 %v2670_v19 }
 0x19c   :  { %1229 = vmatmul.bf16.vlgmr.msra.gmra.mxu2 %v953_v29  ;;  %v484_v56 = vsel %vm473_vm4, %v483_v52, %v2631_v13  ;;  %v2712_v13 = vunpack.i.h.bf16 %v2710_v6 }
 0x19d   :  { %v672_v7 = vsel %vm473_vm4, %v671_v47, %v2676_v38  ;;  %v478_v62 = vsel %vm473_vm4, %v477_v11, %v2677_v31  ;;  %1263 = vmatpush.bf16.msrb.mxu2 %v2499_v40  ;;  %v615_v25 = vsel %vm471_vm3, %v4020_v26, %v2672_v14  ;;  %v705_v21 = vsel %vm471_vm3, %v4021_v5, %v2671_v51  ;;  %v2506_v47 = vld [vmem:[%s3994_s3 + $0xc0] sm:$0xff] }
 0x19e   :  { %v673_v50 = vsel %vm475_vm5, %v672_v7, %v2681_v48  ;;  %v479_v46 = vsel %vm475_vm5, %v478_v62, %v2682_v53  ;;  %v2711_v31 = vunpack.i.l.bf16 %v2710_v6  ;;  %1282 = vmatpush.bf16.msrb.mxu3 %v2506_v47 }
 0x19f   :  { %v899_v2 = vrot.slane %v673_v50, 4  ;;  %v867_v12 = vrot.slane %v673_v50, 2  ;;  %v4022_v50 = vld [vmem:[#allocation11_spill] sm:$0xff] }
 0x1a0   :  { %v2725_v23 = vpop.permute.xlu2 %2724 }
 0x1a1   :  { %v946_v22 = vsel %vm931_vm7, %v3575_v41, %v899_v2  ;;  %v2498_v41 = vld [vmem:[%s3994_s3 + $0x80] sm:$0xff]  ;;  %v2727_v45 = vunpack.i.h.bf16 %v2725_v23 }
 0x1a2   :  { %v2685_v55 = vpop.permute.xlu0 %2684  ;;  %v2690_v63 = vpop.permute.xlu1 %2689  ;;  %1264 = vmatpush.bf16.msrb.mxu2 %v2498_v41  ;;  %v4024_v41 = vld [vmem:[#allocation13_spill] sm:$0xff] }
 0x1a3   :  { %v2687_v32 = vunpack.i.h.bf16 %v2685_v55  ;;  %v2686_v44 = vunpack.i.l.bf16 %v2685_v55  ;;  %v2692_v27 = vunpack.i.h.bf16 %v2690_v63  ;;  %v2691_v4 = vunpack.i.l.bf16 %v2690_v63 }
 0x1a5   :  { %v616_v28 = vsel %vm473_vm4, %v615_v25, %v2687_v32  ;;  %v706_v35 = vsel %vm473_vm4, %v705_v21, %v2686_v44  ;;  %v548_v8 = vsel %vm475_vm5, %v547_v57, %v2692_v27  ;;  %v485_v36 = vsel %vm475_vm5, %v484_v56, %v2691_v4 }
 0x1a6   :  { %v930_v60 = vsel %vm926_vm6, %v485_v36, %v3553_v3  ;;  %v617_v59 = vsel %vm475_vm5, %v616_v28, %v2697_v37  ;;  %v707_v34 = vsel %vm475_vm5, %v706_v35, %v2696_v39  ;;  %v865_v19 = vrot.slane %v485_v36, 2  ;;  %v4025_v39 = vld [vmem:[#allocation12_spill] sm:$0xff] }
 0x1a7   :  { %v928_v0 = vsel %vm926_vm6, %v479_v46, %v548_v8  ;;  %v935_v33 = vsel %vm931_vm7, %v930_v60, %v3556_v18  ;;  %v909_v49 = vrot.slane %v707_v34, 4  ;;  %v879_v15 = vrot.slane %v707_v34, 2 }
 0x1a8   :  { %v933_v38 = vsel %vm931_vm7, %v928_v0, %v617_v59  ;;  %v3698_v61 = vsel %vm936_vm8, %v935_v33, %v867_v12  ;;  %v2726_v4 = vunpack.i.l.bf16 %v2725_v23  ;;  %v2740_v36 = vpop.permute.xlu2 %2739 }
 0x1a9   :  { %v938_v3 = vsel %vm936_vm8, %v933_v38, %v865_v19  ;;  %v950_v24 = vsel %vm936_vm8, %v946_v22, %v909_v49  ;;  %v2742_v0 = vunpack.i.h.bf16 %v2740_v36  ;;  %v2741_v38 = vunpack.i.l.bf16 %v2740_v36  ;;  %v2519_v36 = vld [vmem:[%s3996_s5 + $0x28] sm:$0xff] }
 0x1aa   :  { %v2700_v48 = vpop.permute.xlu0 %2699  ;;  %v2705_v29 = vpop.permute.xlu1 %2704  ;;  %v954_v20 = vpack.c.bf16 %v950_v24, %v938_v3 }
 0x1ab   :  { %v2702_v43 = vunpack.i.h.bf16 %v2700_v48  ;;  %v2701_v10 = vunpack.i.l.bf16 %v2700_v48  ;;  %v2707_v18 = vunpack.i.h.bf16 %v2705_v29  ;;  %v2706_v7 = vunpack.i.l.bf16 %v2705_v29 }
 0x1ac   :  { %1247 = vmatmul.bf16.vlgmr.msra.gmra.mxu3 %v954_v20 }
 0x1ad   :  { %v739_v2 = vsel %vm471_vm3, %v4022_v50, %v2702_v43  ;;  %v736_v40 = vsel %vm471_vm3, %v4023_v42, %v2701_v10 }
 0x1ae   :  { %v737_v14 = vsel %vm473_vm4, %v736_v40, %v2706_v7  ;;  %v740_v51 = vsel %vm473_vm4, %v739_v2, %v2707_v18 }
 0x1af   :  { %v738_v16 = vsel %vm475_vm5, %v737_v14, %v2711_v31  ;;  %v741_v52 = vsel %vm475_vm5, %v740_v51, %v2712_v13 }
 0x1b0   :  { %v890_v11 = vrot.slane %v738_v16, 2  ;;  %v918_v22 = vrot.slane %v738_v16, 4  ;;  %v891_v30 = vrot.slane %v741_v52, 2  ;;  %v919_v8 = vrot.slane %v741_v52, 4  ;;  %v2755_v40 = vpop.permute.xlu2 %2754 }
 0x1b1   :  { %v2756_v51 = vunpack.i.l.bf16 %v2755_v40 }
 0x1b2   :  { %v2715_v57 = vpop.permute.xlu0 %2714  ;;  %v2720_v56 = vpop.permute.xlu1 %2719  ;;  %v943_v53 = vsel %vm926_vm6, %v878_v9, %v890_v11  ;;  %v957_v62 = vpack.c.bf16 %v918_v22, %v918_v22  ;;  %v944_v55 = vsel %vm926_vm6, %v879_v15, %v891_v30  ;;  %v958_v33 = vpack.c.bf16 %v919_v8, %v919_v8  ;;  %v4027_v15 = vld [vmem:[#allocation15_spill] sm:$0xff] }
 0x1b3   :  { %v2717_v63 = vunpack.i.h.bf16 %v2715_v57  ;;  %v2716_v32 = vunpack.i.l.bf16 %v2715_v57  ;;  %v2722_v44 = vunpack.i.h.bf16 %v2720_v56  ;;  %v2721_v27 = vunpack.i.l.bf16 %v2720_v56 }
 0x1b4   :  { %1234 = vmatmul.bf16.gmra.mxu2 %v957_v62  ;;  %v2757_v57 = vunpack.i.h.bf16 %v2755_v40  ;;  %v2514_v40 = vld [vmem:[%s3996_s5] sm:$0xff] }
 0x1b5   :  { %v820_v37 = vsel %vm471_vm3, %v4024_v41, %v2717_v63  ;;  %v786_v26 = vsel %vm471_vm3, %v4025_v39, %v2716_v32  ;;  %v2759_v32 = vld [vmem:[%s3995_s4] ss:$0 sm:$0xff] }
 0x1b6   :  { %v821_v25 = vsel %vm473_vm4, %v820_v37, %v2722_v44  ;;  %v787_v5 = vsel %vm473_vm4, %v786_v26, %v2721_v27 }
 0x1b7   :  { %v822_v21 = vsel %vm475_vm5, %v821_v25, %v2727_v45  ;;  %v788_v6 = vsel %vm475_vm5, %v787_v5, %v2726_v4  ;;  %v2521_v25 = vld [vmem:[%s3996_s5 + $0x38] sm:$0xff] }
 0x1b8   :  { %v910_v28 = vrot.slane %v822_v21, 4  ;;  %v900_v35 = vrot.slane %v788_v6, 4  ;;  %v2529_v5 = vld [vmem:[%s3996_s5 + $0x78] sm:$0xff]  ;;  %1622 = vmatpush.bf16.msra.mxu2 %v2521_v25  ;;  %v2520_v21 = vld [vmem:[%s3996_s5 + $0x30] sm:$0xff] }
 0x1b9   :  { %1635 = vmatpush.bf16.msra.mxu3 %v2529_v5  ;;  %v2528_v6 = vld [vmem:[%s3996_s5 + $0x70] sm:$0xff]  ;;  %v2380_v25 = vld [vmem:[%s3998_s7 + $0x38] sm:$0xf0]  ;;  %v2554_v5 = vld [vmem:[%s3998_s7 + $0x24] sm:$0xf] }
 0x1ba   :  { %v2730_v58 = vpop.permute.xlu0 %2729  ;;  %v2735_v46 = vpop.permute.xlu1 %2734  ;;  %v947_v60 = vsel %vm931_vm7, %v943_v53, %v900_v35 }
 0x1bb   :  { %v2732_v59 = vunpack.i.h.bf16 %v2730_v58  ;;  %v2731_v12 = vunpack.i.l.bf16 %v2730_v58  ;;  %v2737_v34 = vunpack.i.h.bf16 %v2735_v46  ;;  %v2736_v19 = vunpack.i.l.bf16 %v2735_v46  ;;  %v2527_v58 = vld [vmem:[%s3996_s5 + $0x68] sm:$0xff] }
 0x1bc   :  { %v951_v49 = vsel %vm936_vm8, %v947_v60, %v910_v28  ;;  %1252 = vmatmul.bf16.gmra.mxu3 %v958_v33  ;;  %1623 = vmatpush.bf16.msra.mxu2 %v2520_v21  ;;  %v2548_v21 = vld [vmem:[%s3996_s5 + $0x110] sm:$0xff] }
 0x1bd   :  { %v823_v3 = vsel %vm471_vm3, %v3372_v54, %v2732_v59  ;;  %v789_v47 = vsel %vm471_vm3, %v3368_v1, %v2731_v12  ;;  %v955_v48 = vpack.c.bf16 %v951_v49, %v3637_v17  ;;  %v4026_v17 = vld [vmem:[#allocation14_spill] sm:$0xff]  ;;  %1636 = vmatpush.bf16.msra.mxu3 %v2528_v6  ;;  %v2518_v12 = vld [vmem:[%s3996_s5 + $0x20] sm:$0xff] }
 0x1be   :  { %v824_v29 = vsel %vm473_vm4, %v823_v3, %v2737_v34  ;;  %v790_v24 = vsel %vm473_vm4, %v789_v47, %v2736_v19  ;;  %v2526_v34 = vld [vmem:[%s3996_s5 + $0x60] sm:$0xff]  ;;  %v2517_v47 = vld [vmem:[%s3996_s5 + $0x18] sm:$0xff] }
 0x1bf   :  { %v825_v43 = vsel %vm475_vm5, %v824_v29, %v2742_v0  ;;  %v791_v10 = vsel %vm475_vm5, %v790_v24, %v2741_v38 }
 0x1c0   :  { %v911_v18 = vrot.slane %v825_v43, 4  ;;  %v901_v7 = vrot.slane %v791_v10, 4  ;;  %1624 = vmatpush.bf16.msra.mxu2 %v2519_v36  ;;  %v2364_v36 = vld [vmem:[%s3998_s7 + $0x18] sm:$0xf0] }
 0x1c1   :  { %1637 = vmatpush.bf16.msra.mxu3 %v2527_v58  ;;  %v2547_v58 = vld [vmem:[%s3996_s5 + $0x108] sm:$0xff] }
 0x1c2   :  { %v2745_v20 = vpop.permute.xlu0 %2744  ;;  %v2750_v13 = vpop.permute.xlu1 %2749  ;;  %v948_v54 = vsel %vm931_vm7, %v944_v55, %v901_v7  ;;  %v2524_v7 = vld [vmem:[%s3996_s5 + $0x50] sm:$0xff] }
 0x1c3   :  { %v2746_v31 = vunpack.i.l.bf16 %v2745_v20  ;;  %v2751_v50 = vunpack.i.l.bf16 %v2750_v13  ;;  %v952_v1 = vsel %vm936_vm8, %v948_v54, %v911_v18  ;;  %v2747_v23 = vunpack.i.h.bf16 %v2745_v20  ;;  %v2516_v18 = vld [vmem:[%s3996_s5 + $0x10] sm:$0xff] }
 0x1c4   :  { %1265 = vmatmul.bf16.vlgmr.msrb.gmra.mxu2 %v955_v48  ;;  %v956_v42 = vpack.c.bf16 %v952_v1, %v3698_v61  ;;  %v2752_v16 = vunpack.i.h.bf16 %v2750_v13  ;;  %v2525_v48 = vld [vmem:[%s3996_s5 + $0x58] sm:$0xff]  ;;  %v2523_v1 = vld [vmem:[%s3996_s5 + $0x48] sm:$0xff] }
 0x1c5   :  { %v854_v2 = vsel %vm471_vm3, %v4026_v17, %v2746_v31  ;;  %v857_v11 = vsel %vm471_vm3, %v4027_v15, %v2747_v23  ;;  %1625 = vmatpush.bf16.msra.mxu2 %v2518_v12  ;;  %1638 = vmatpush.bf16.msra.mxu3 %v2526_v34  ;;  %v2545_v23 = vld [vmem:[%s3996_s5 + $0xf8] sm:$0xff]  ;;  %v2543_v15 = vld [vmem:[%s3996_s5 + $0xe8] sm:$0xff]  ;;  %v2546_v34 = vld [vmem:[%s3996_s5 + $0x100] sm:$0xff] }
 0x1c6   :  { %v855_v14 = vsel %vm473_vm4, %v854_v2, %v2751_v50  ;;  %v858_v30 = vsel %vm473_vm4, %v857_v11, %v2752_v16  ;;  %v2515_v50 = vld [vmem:[%s3996_s5 + $0x8] sm:$0xff]  ;;  %v2544_v16 = vld [vmem:[%s3996_s5 + $0xf0] sm:$0xff]  ;;  %v2534_v11 = vld [vmem:[%s3996_s5 + $0xa0] sm:$0xff] }
 0x1c7   :  { %v856_v9 = vsel %vm475_vm5, %v855_v14, %v2756_v51  ;;  %v859_v61 = vsel %vm475_vm5, %v858_v30, %v2757_v57  ;;  %v2522_v14 = vld [vmem:[%s3996_s5 + $0x40] sm:$0xff]  ;;  %v2537_v51 = vld [vmem:[%s3996_s5 + $0xb8] sm:$0xff] }
 0x1c8   :  { %v920_v52 = vrot.slane %v856_v9, 4  ;;  %v921_v56 = vrot.slane %v859_v61, 4  ;;  %v2536_v9 = vld [vmem:[%s3996_s5 + $0xb0] sm:$0xff]  ;;  %v2533_v30 = vld [vmem:[%s3996_s5 + $0x98] sm:$0xff] }
 0x1c9   :  { %1626 = vmatpush.bf16.msra.mxu2 %v2517_v47  ;;  %1639 = vmatpush.bf16.msra.mxu3 %v2525_v48  ;;  %v2541_v57 = vld [vmem:[%s3996_s5 + $0xd8] sm:$0xff]  ;;  %v2532_v61 = vld [vmem:[%s3996_s5 + $0x90] sm:$0xff]  ;;  %v2550_v47 = vld [vmem:[%s3998_s7 + $0x4] sm:$0xf] }
 0x1ca   :  { %v959_v22 = vpack.c.bf16 %v920_v52, %v920_v52  ;;  %v960_v53 = vpack.c.bf16 %v921_v56, %v921_v56  ;;  %v2535_v52 = vld [vmem:[%s3996_s5 + $0xa8] sm:$0xff]  ;;  %v2540_v56 = vld [vmem:[%s3996_s5 + $0xd0] sm:$0xff] }
 0x1cb   :  { %v2356_v48 = vld [vmem:[%s3998_s7 + $0x8] sm:$0xf0] }
 0x1cc   :  { %1283 = vmatmul.bf16.vlgmr.msrb.gmra.mxu3 %v956_v42 }
 0x1cd   :  { %1627 = vmatpush.bf16.msra.mxu2 %v2516_v18  ;;  %1640 = vmatpush.bf16.msra.mxu3 %v2524_v7  ;;  %v2370_v18 = vld [vmem:[%s3998_s7 + $0x20] sm:$0xf]  ;;  %v2555_v7 = vld [vmem:[%s3998_s7 + $0x24] sm:$0xf0] }
 0x1d1   :  { %1628 = vmatpush.bf16.msra.mxu2 %v2515_v50  ;;  %1641 = vmatpush.bf16.msra.mxu3 %v2523_v1 }
 0x1d4   :  { %1270 = vmatmul.bf16.gmra.mxu2 %v959_v22  ;;  %v2542_v22 = vld [vmem:[%s3996_s5 + $0xe0] sm:$0xff] }
 0x1d5   :  { %1629 = vmatpush.bf16.msra.mxu2 %v2514_v40  ;;  %1642 = vmatpush.bf16.msra.mxu3 %v2522_v14 }
 0x1d9   :  { %1648 = vmatpush.bf16.msrb.mxu2 %v2537_v51  ;;  %1661 = vmatpush.bf16.msrb.mxu3 %v2545_v23  ;;  %v2565_v51 = vld [vmem:[%s4000_s9 + $0x38] sm:$0xff]  ;;  %v2564_v23 = vld [vmem:[%s4000_s9 + $0x30] sm:$0xff] }
 0x1da   :  { %1908 = vmatpush.bf16.msrb.mxu1 %v2565_v51 }
 0x1dc   :  { %1288 = vmatmul.bf16.gmra.mxu3 %v960_v53  ;;  %v2531_v53 = vld [vmem:[%s3996_s5 + $0x88] sm:$0xff] }
 0x1dd   :  { %1649 = vmatpush.bf16.msrb.mxu2 %v2536_v9  ;;  %1662 = vmatpush.bf16.msrb.mxu3 %v2544_v16  ;;  %v2573_v9 = vld [vmem:[%s4000_s9 + $0x78] sm:$0xff]  ;;  %v2572_v16 = vld [vmem:[%s4000_s9 + $0x70] sm:$0xff] }
 0x1de   :  { %1909 = vmatpush.bf16.msrb.mxu1 %v2564_v23 }
 0x1e1   :  { %1650 = vmatpush.bf16.msrb.mxu2 %v2535_v52  ;;  %1663 = vmatpush.bf16.msrb.mxu3 %v2543_v15  ;;  %v2563_v52 = vld [vmem:[%s4000_s9 + $0x28] sm:$0xff] }
 0x1e2   :  { %1910 = vmatpush.bf16.msrb.mxu1 %v2563_v52 }
 0x1e5   :  { %1651 = vmatpush.bf16.msrb.mxu2 %v2534_v11  ;;  %1664 = vmatpush.bf16.msrb.mxu3 %v2542_v22  ;;  %v2571_v22 = vld [vmem:[%s4000_s9 + $0x68] sm:$0xff] }
 0x1e9   :  { %1652 = vmatpush.bf16.msrb.mxu2 %v2533_v30  ;;  %1665 = vmatpush.bf16.msrb.mxu3 %v2541_v57  ;;  %v2760_v30 = vld [vmem:[%s3997_s6] ss:$0 sm:$0xff] }
 0x1ea   :  { %v2562_v57 = vld [vmem:[%s4000_s9 + $0x20] sm:$0xff] }
 0x1eb   :  { %1911 = vmatpush.bf16.msrb.mxu1 %v2562_v57 }
 0x1ed   :  { %1653 = vmatpush.bf16.msrb.mxu2 %v2532_v61  ;;  %1666 = vmatpush.bf16.msrb.mxu3 %v2540_v56  ;;  %v2570_v61 = vld [vmem:[%s4000_s9 + $0x60] sm:$0xff] }
 0x1f1   :  { %1654 = vmatpush.bf16.msrb.mxu2 %v2531_v53  ;;  %v2561_v53 = vld [vmem:[%s4000_s9 + $0x18] sm:$0xff] }
 0x1f2   :  { %1912 = vmatpush.bf16.msrb.mxu1 %v2561_v53 }
 0x21f   :  { %v1230_v62 = vpop.f32.mrf.mxu2 }
 0x220   :  { %v1231_v28 = vadd.f32 %v2759_v32, %v1230_v62  ;;  %v2539_v62 = vld [vmem:[%s3996_s5 + $0xc8] sm:$0xff] }
 0x221   :  { %1667 = vmatpush.bf16.msrb.mxu3 %v2539_v62 }
 0x227   :  { %v1232_v55 = vpop.f32.mrf.mxu2 }
 0x228   :  { %v1233_v19 = vadd.f32 %v2759_v32, %v1232_v55  ;;  %v2530_v55 = vld [vmem:[%s3996_s5 + $0x80] sm:$0xff] }
 0x229   :  { %1655 = vmatpush.bf16.msrb.mxu2 %v2530_v55 }
 0x22f   :  { %v1248_v63 = vpop.f32.mrf.mxu3 }
 0x230   :  { %v1249_v35 = vadd.f32 %v1248_v63, %v1231_v28  ;;  %v2538_v63 = vld [vmem:[%s3996_s5 + $0xc0] sm:$0xff]  ;;  %v2372_v28 = vld [vmem:[%s3998_s7 + $0x28] sm:$0xf0] }
 0x231   :  { %1668 = vmatpush.bf16.msrb.mxu3 %v2538_v63  ;;  %v2569_v63 = vld [vmem:[%s4000_s9 + $0x58] sm:$0xff] }
 0x237   :  { %v1235_v44 = vpop.f32.mrf.mxu2  ;;  %v1250_v45 = vpop.f32.mrf.mxu3 }
 0x238   :  { %v1236_v27 = vadd.f32 %v2759_v32, %v1235_v44  ;;  %v1251_v33 = vadd.f32 %v1250_v45, %v1233_v19 }
 0x23f   :  { %v1237_v4 = vpop.f32.mrf.mxu2  ;;  %v1253_v41 = vpop.f32.mrf.mxu3 }
 0x240   :  { %v1254_v37 = vadd.f32 %v1253_v41, %v1236_v27  ;;  %v2549_v41 = vld [vmem:[%s3996_s5 + $0x118] sm:$0xff] }
 0x247   :  { %v1266_v39 = vpop.f32.mrf.mxu2  ;;  %v1255_v26 = vpop.f32.mrf.mxu3 }
 0x248   :  { %v1267_v46 = vadd.f32 %v1266_v39, %v1249_v35  ;;  %v2556_v26 = vld [vmem:[%s3998_s7 + $0x34] sm:$0xf]  ;;  %v2375_v35 = vor.u32 %v2554_v5, %v2372_v28  ;;  %v2566_v28 = vld [vmem:[%s4000_s9 + $0x40] sm:$0xff] }
 0x249   :  { %v2383_v6 = vor.u32 %v2556_v26, %v2380_v25  ;;  %v2558_v26 = vld [vmem:[%s4000_s9] sm:$0xff] }
 0x24b   :  { %1763 = vmatpush.bf16.msrb.mxu0 %v2383_v6  ;;  %v2567_v6 = vld [vmem:[%s4000_s9 + $0x48] sm:$0xff] }
 0x24f   :  { %v1268_v8 = vpop.f32.mrf.mxu2  ;;  %v1284_v60 = vpop.f32.mrf.mxu3  ;;  %1764 = vmatpush.bf16.msrb.mxu0 %v2375_v35  ;;  %v1697_v35 = vld [vmem:[%s3999_s8] sm:$0x3]  ;;  %s2791_s8 = smov [#allocation2]  }
 0x250   :  { %v1285_v59 = vadd.f32 %v1284_v60, %v1267_v46  ;;  %v1269_v29 = vadd.f32 %v1268_v8, %v1251_v33  ;;  %v2552_v8 = vld [vmem:[%s3998_s7 + $0x14] sm:$0xf]  ;;  %s1940_s14 = sshll.u32 %s2791_s8, 4  ;;  %s1941_s14 = int_to_ptr.vmem [resolvable:$true] %s1940_s14 }
 0x251   :  { %v2367_v46 = vor.u32 %v2552_v8, %v2364_v36  ;;  %v1700_v8 = vperm.slane %v1697_v35, 1 }
 0x252   :  { %v3773_v0 = vmax.f32 %v1285_v59, 0.0 }
 0x253   :  { %1765 = vmatpush.bf16.msrb.mxu0 %v2367_v46 }
 0x254   :  { %v1303_v49 = vrot.slane %v3773_v0, 6  ;;  %v1297_v38 = vrot.slane %v3773_v0, 2  ;;  %v1301_v32 = vrot.slane %v3773_v0, 4 }
 0x256   :  { %1304 = vrot.lane.b32.xlu0 %v1303_v49, %s2790_s17  ;;  %1298 = vrot.lane.b32.xlu1 %v1297_v38, %s2790_s17 }
 0x257   :  { %v1271_v3 = vpop.f32.mrf.mxu2  ;;  %v1286_v43 = vpop.f32.mrf.mxu3 }
 0x258   :  { %v1272_v24 = vadd.f32 %v1271_v3, %v1254_v37  ;;  %v1287_v10 = vadd.f32 %v1286_v43, %v1269_v29  ;;  %v2359_v29 = vor.u32 %v2550_v47, %v2356_v48  ;;  %v2557_v43 = vld [vmem:[%s3998_s7 + $0x34] sm:$0xf0] }
 0x25a   :  { %v3791_v20 = vmax.f32 %v1287_v10, 0.0  ;;  %1766 = vmatpush.bf16.msrb.mxu0 %v2359_v29 }
 0x25c   :  { %v1314_v13 = vrot.slane %v3791_v20, 6  ;;  %v1308_v54 = vrot.slane %v3791_v20, 2  ;;  %v1312_v12 = vrot.slane %v3791_v20, 4 }
 0x25e   :  { %1315 = vrot.lane.b32.xlu2 %v1314_v13, %s2790_s17  ;;  %1309 = vrot.lane.b32.xlu0 %v1308_v54, %s2790_s17  ;;  %v2371_v13 = vor.u32 %v2555_v7, %v2370_v18  ;;  %v2553_v54 = vld [vmem:[%s3998_s7 + $0x14] sm:$0xf0] }
 0x25f   :  { %v1273_v31 = vpop.f32.mrf.mxu2  ;;  %v1289_v17 = vpop.f32.mrf.mxu3 }
 0x260   :  { %v3803_v2 = vadd.f32 %v1289_v17, %v1272_v24  ;;  %v2378_v24 = vld [vmem:[%s3998_s7 + $0x30] sm:$0xf]  ;;  %v2354_v17 = vld [vmem:[%s3998_s7] sm:$0xf] }
 0x261   :  { %v2379_v10 = vor.u32 %v2557_v43, %v2378_v24 }
 0x262   :  { %v1295_v38 = vmax.f32 %v3803_v2, 0.0  ;;  %v2551_v2 = vld [vmem:[%s3998_s7 + $0x4] sm:$0xf0] }
 0x264   :  { %v1326_v3 = vpack.c.bf16 %v1295_v38, %v1295_v38  ;;  %v2761_v38 = vld [vmem:[%s4001_s10] ss:$0 sm:$0xff] }
 0x267   :  { %v1291_v42 = vpop.f32.mrf.mxu3 }
 0x268   :  { %v2355_v42 = vor.u32 %v2551_v2, %v2354_v17 }
 0x2b8   :  { %v1316_v60 = vpop.permute.xlu2 %1315 }
 0x2b9   :  { %v1321_v19 = vsel %vm473_vm4, %v1312_v12, %v1316_v60  ;;  %v1699_v60 = vperm.slane %v1697_v35, 0 }
 0x2ba   :  { %v1325_v33 = vpack.c.bf16 %v1321_v19, %v1321_v19 }
 0x2c8   :  { %v1305_v44 = vpop.permute.xlu0 %1304  ;;  %v1299_v27 = vpop.permute.xlu1 %1298 }
 0x2c9   :  { %v1319_v45 = vsel %vm473_vm4, %v1301_v32, %v1305_v44  ;;  %v1318_v4 = vsel %vm473_vm4, %v3773_v0, %v1299_v27  ;;  %v2560_v44 = vld [vmem:[%s4000_s9 + $0x10] sm:$0xff] }
 0x2ca   :  { %v1323_v37 = vpack.c.bf16 %v1319_v45, %v1319_v45  ;;  %v1322_v39 = vpack.c.bf16 %v1318_v4, %v1318_v4  ;;  %v2568_v45 = vld [vmem:[%s4000_s9 + $0x50] sm:$0xff]  ;;  %1913 = vmatpush.bf16.msrb.mxu1 %v2560_v44  ;;  %v2559_v4 = vld [vmem:[%s4000_s9 + $0x8] sm:$0xff] }
 0x2cc   :  { %1630 = vmatmul.bf16.vlgmr.msra.gmra.mxu2 %v1322_v39  ;;  %1643 = vmatmul.bf16.vlgmr.msra.gmra.mxu3 %v1323_v37 }
 0x2cd   :  { %1678 = vmatpush.bf16.msra.mxu3 %v2549_v41  ;;  %1921 = vmatpush.bf16.msra.mxu2 %v2573_v9 }
 0x2ce   :  { %1914 = vmatpush.bf16.msrb.mxu1 %v2559_v4 }
 0x2d0   :  { %v1310_v59 = vpop.permute.xlu0 %1309 }
 0x2d1   :  { %1679 = vmatpush.bf16.msra.mxu3 %v2548_v21  ;;  %v1320_v0 = vsel %vm473_vm4, %v3791_v20, %v1310_v59  ;;  %v2362_v20 = vld [vmem:[%s3998_s7 + $0x10] sm:$0xf]  ;;  %1922 = vmatpush.bf16.msra.mxu2 %v2572_v16 }
 0x2d2   :  { %v1324_v49 = vpack.c.bf16 %v1320_v0, %v1320_v0  ;;  %v2363_v31 = vor.u32 %v2553_v54, %v2362_v20  ;;  %1915 = vmatpush.bf16.msrb.mxu1 %v2558_v26 }
 0x2d5   :  { %1680 = vmatpush.bf16.msra.mxu3 %v2547_v58  ;;  %1923 = vmatpush.bf16.msra.mxu2 %v2571_v22 }
 0x2d9   :  { %1681 = vmatpush.bf16.msra.mxu3 %v2546_v34  ;;  %1924 = vmatpush.bf16.msra.mxu2 %v2570_v61 }
 0x2dc   :  { %1656 = vmatmul.bf16.vlgmr.msrb.gmra.mxu2 %v1324_v49  ;;  %1669 = vmatmul.bf16.vlgmr.msrb.gmra.mxu3 %v1325_v33 }
 0x2dd   :  { %1750 = vmatpush.bf16.msrb.mxu3 %v2379_v10  ;;  %1925 = vmatpush.bf16.msra.mxu2 %v2569_v63 }
 0x2e1   :  { %1751 = vmatpush.bf16.msrb.mxu3 %v2371_v13  ;;  %1926 = vmatpush.bf16.msra.mxu2 %v2568_v45 }
 0x2e5   :  { %1752 = vmatpush.bf16.msrb.mxu3 %v2363_v31  ;;  %1927 = vmatpush.bf16.msra.mxu2 %v2567_v6 }
 0x2e9   :  { %1753 = vmatpush.bf16.msrb.mxu3 %v2355_v42  ;;  %1928 = vmatpush.bf16.msra.mxu2 %v2566_v28 }
 0x2ec   :  { %2351 = vmatmul.msk.bf16.vlgmr.msra.gmra.mxu3 %vm473_vm4, %v1326_v3 }
 0x34f   :  { %v1631_v50 = vpop.f32.mrf.mxu2  ;;  %v1644_v1 = vpop.f32.mrf.mxu3 }
 0x350   :  { %v1632_v56 = vadd.f32 %v2760_v30, %v1631_v50 }
 0x352   :  { %v1645_v32 = vadd.f32 %v1644_v1, %v1632_v56 }
 0x357   :  { %v1633_v40 = vpop.f32.mrf.mxu2  ;;  %v1646_v14 = vpop.f32.mrf.mxu3 }
 0x35f   :  { %v1657_v15 = vpop.f32.mrf.mxu2  ;;  %v1670_v11 = vpop.f32.mrf.mxu3 }
 0x360   :  { %v1658_v27 = vadd.f32 %v1657_v15, %v1645_v32 }
 0x362   :  { %v1671_v41 = vadd.f32 %v1670_v11, %v1658_v27 }
 0x367   :  { %v1659_v62 = vpop.f32.mrf.mxu2  ;;  %v1672_v55 = vpop.f32.mrf.mxu3 }
 0x36f   :  { %v1683_v37 = vpop.f32.mrf.mxu3 }
 0x370   :  { %v1684_v39 = vadd.f32 %v1683_v37, %v1671_v41 }
 0x372   :  { %v1687_v25 = vmax.f32 %v1684_v39, 0.0 }
 0x374   :  { %v1688_v5 = vpack.c.bf16 %v1687_v25, %v1687_v25 }
 0x376   :  { %2384 = vmatmul.msk.bf16.vlgmr.msrb.gmra.mxu3 %vm473_vm4, %v1688_v5  ;;  %2385 = vmatmul.msk.bf16.vlgmr.msrb.gmra.mxu0 %vm473_vm4, %v1688_v5 }
 0x377   :  { %v1685_v21 = vpop.f32.mrf.mxu3 }
 0x3f3   :  { %v1768_v36 = vpop.f32.mrf.mxu0 }
 0x3f4   :  { %v1769_v58 = vadd.f32 %v1768_v36, %v1700_v8 }
 0x3f6   :  { %v1773_v46 = vmax.f32 %v1769_v58, 0.0 }
 0x3f8   :  { %v1775_v59 = vpack.c.bf16 %v1773_v46, %v1773_v46 }
 0x3f9   :  { %v1755_v12 = vpop.f32.mrf.mxu3 }
 0x3fa   :  { %v1756_v34 = vadd.f32 %v1755_v12, %v1699_v60  ;;  %1929 = vmatmul.bf16.vlgmr.msra.gmra.mxu2 %v1775_v59 }
 0x3fb   :  { %v1770_v19 = vpop.f32.mrf.mxu0 }
 0x3fc   :  { %v1772_v0 = vmax.f32 %v1756_v34, 0.0 }
 0x3fe   :  { %v1774_v33 = vpack.c.bf16 %v1772_v0, %v1772_v0 }
 0x400   :  { %1916 = vmatmul.bf16.vlgmr.msrb.gmra.mxu1 %v1774_v33 }
 0x401   :  { %v1757_v49 = vpop.f32.mrf.mxu3 }
 0x47d   :  { %v1917_v3 = vpop.f32.mrf.mxu1  ;;  %v1930_v47 = vpop.f32.mrf.mxu2 }
 0x47e   :  { %v1918_v48 = vadd.f32 %v2761_v38, %v1917_v3 }
 0x480   :  { %v1931_v29 = vadd.f32 %v1930_v47, %v1918_v48 }
 0x482   :  { %1934 = vst [vmem:[#allocation2] sm:$0x3] %v1931_v29 }
 0x483   :  { %1945 = dma.vmem_to_hbm [thread:$0]  %s1941_s14, 32, %s1943_s0, [#allocation3]  }
 0x485   :  { %v1919_v24 = vpop.f32.mrf.mxu1  ;;  %v1932_v43 = vpop.f32.mrf.mxu2 }
 0x486   :  { %2786 = dma.done.wait [#allocation3], 32  }
 0x487   :  { %2787 = vsyncadd [#allocation3], 4294967264 }
 0x488   :  { %1950 = vsyncpa [#allocation3], 1 }

</bundles_post_ra>
